<compile_context>
chip_gen: v6e
topology: v6e:2x2x1
jax: 0.10.0
libtpu: 0.0.40
codegen_flags: <defaults>
</compile_context>

<pallas_src>
import jax
import jax.numpy as jnp
from jax.experimental import pallas as pl
from jax.experimental.pallas import tpu as pltpu

IN_RAW = 28 * 28          # 784 (multiple of 16 -> fine for bf16 sublane packing)
H = 512
OUT_RAW = 10
OUT_PAD = 128             # lane-dense output width (one MXU pass, unmasked vst)


def _round_up(x, m):
    return (x + m - 1) // m * m


def _default_tile_rows():
    """Per-generation batch-tile default: 512 on v5e, 1024 on v6e/v7x."""
    try:
        kind = jax.devices()[0].device_kind.lower()
    except Exception:
        return 1024
    if "v5 lite" in kind or "v5lite" in kind or "v5e" in kind:
        return 512
    return 1024


def mlp_kernel(x_ref, w1_ref, b1_ref, w2_ref, b2_ref, w3_ref, b3_ref, o_ref):
    # Layer 1: [TB,784]bf16 @ [784,512]bf16 -> f32, +bias, ReLU, -> bf16
    h1 = jnp.dot(x_ref[...], w1_ref[...], preferred_element_type=jnp.float32)
    h1 = jnp.maximum(h1 + b1_ref[...], 0.0).astype(jnp.bfloat16)
    # Layer 2: [TB,512]bf16 @ [512,512]bf16 -> f32, +bias, ReLU, -> bf16
    h2 = jnp.dot(h1, w2_ref[...], preferred_element_type=jnp.float32)
    h2 = jnp.maximum(h2 + b2_ref[...], 0.0).astype(jnp.bfloat16)
    # Layer 3: [TB,512]bf16 @ [512,128]bf16 -> f32 logits, stored as bf16
    logits = jnp.dot(h2, w3_ref[...], preferred_element_type=jnp.float32)
    o_ref[...] = (logits + b3_ref[...]).astype(o_ref.dtype)


def neural_network_forward(x, params, tb=None):
    """x: [B, 28, 28] float32 -> logits [B, 10] float32."""
    w1, b1, w2, b2, w3, b3 = params
    B = x.shape[0]
    if tb is None:
        tb = _default_tile_rows()

    # ---- wrapper-side layout prep (row padding + bf16 cast only) ----------
    x_flat = x.reshape(B, IN_RAW).astype(jnp.bfloat16)

    TB = min(tb, _round_up(B, 8))
    B_pad = _round_up(B, TB)
    # Keep >=2 grid steps when the batch allows so the "parallel" axis can be
    # sharded across v7x's two TensorCores (free ~2x there, negligible cost
    # elsewhere).
    if B_pad // TB < 2 and TB >= 16:
        TB = _round_up(TB // 2, 8)
        B_pad = _round_up(B, TB)

    x_pad = jnp.pad(x_flat, ((0, B_pad - B), (0, 0)))  # rows only, no K pad

    w1p = w1.astype(jnp.bfloat16)                                   # (784,512)
    w2p = w2.astype(jnp.bfloat16)                                   # (512,512)
    w3p = jnp.zeros((H, OUT_PAD), jnp.bfloat16).at[:, :OUT_RAW].set(
        w3.astype(jnp.bfloat16))                                    # (512,128)
    b1p = b1.astype(jnp.float32)                                    # (1,512)
    b2p = b2.astype(jnp.float32)                                    # (1,512)
    b3p = jnp.zeros((1, OUT_PAD), jnp.float32).at[:, :OUT_RAW].set(
        b3.astype(jnp.float32))                                     # (1,128)

    grid = (B_pad // TB,)

    # Resident operands: constant index_map (DMA'd once, stay in VMEM);
    # single pipeline buffer since they never change across grid steps.
    def resident(shape):
        return pl.BlockSpec(shape, lambda i: (0, 0),
                            pipeline_mode=pl.Buffered(1))

    flops = 2 * B_pad * (IN_RAW * H + H * H + H * OUT_PAD)
    bytes_accessed = (
        x_pad.size * 2 + w1p.size * 2 + w2p.size * 2 + w3p.size * 2
        + b1p.size * 4 + b2p.size * 4 + b3p.size * 4
        + B_pad * OUT_PAD * 2)          # bf16 output writeback

    out_pad = pl.pallas_call(
        mlp_kernel,
        out_shape=jax.ShapeDtypeStruct((B_pad, OUT_PAD), jnp.bfloat16),
        grid_spec=pltpu.PrefetchScalarGridSpec(
            num_scalar_prefetch=0,
            grid=grid,
            in_specs=[
                pl.BlockSpec((TB, IN_RAW), lambda i: (i, 0)),   # x tile
                resident((IN_RAW, H)),                          # w1
                resident((1, H)),                               # b1
                resident((H, H)),                               # w2
                resident((1, H)),                               # b2
                resident((H, OUT_PAD)),                         # w3 (padded)
                resident((1, OUT_PAD)),                         # b3 (padded)
            ],
            out_specs=pl.BlockSpec((TB, OUT_PAD), lambda i: (i, 0)),
        ),
        compiler_params=pltpu.CompilerParams(
            dimension_semantics=("parallel",),
            vmem_limit_bytes=32 * 1024 * 1024,
        ),
        cost_estimate=pl.CostEstimate(
            flops=flops, transcendentals=0, bytes_accessed=bytes_accessed),
    )(x_pad, w1p, b1p, w2p, b2p, w3p, b3p)

    return out_pad[:B, :OUT_RAW].astype(jnp.float32)


def init_params(key):
    """Deterministic init mirroring nn.Linear's U(-1/sqrt(fan_in), 1/sqrt(fan_in))."""
    def linear(key, fan_in, fan_out):
        kw, kb = jax.random.split(key)
        bound = 1.0 / jnp.sqrt(jnp.float32(fan_in))
        # stored as [in, out] so the kernel computes x @ W
        w = jax.random.uniform(kw, (fan_in, fan_out), jnp.float32, -bound, bound)
        b = jax.random.uniform(kb, (1, fan_out), jnp.float32, -bound, bound)
        return w, b

    k1, k2, k3 = jax.random.split(key, 3)
    w1, b1 = linear(k1, IN_RAW, H)
    w2, b2 = linear(k2, H, H)
    w3, b3 = linear(k3, H, OUT_RAW)
    return (w1, b1, w2, b2, w3, b3)


if __name__ == "__main__":
    key = jax.random.PRNGKey(0)
    k_params, k_x = jax.random.split(key)

    params = init_params(k_params)
    # PyTorch script uses X = torch.rand(1, 28, 28); use a small batch of 2.
    x = jax.random.uniform(k_x, (2, 28, 28), jnp.float32)

    logits = neural_network_forward(x, params)
    jax.block_until_ready(logits)

    # Reference in plain JAX with the same bf16-weight / f32-acc / bf16-store math.
    w1, b1, w2, b2, w3, b3 = params
    xb = x.reshape(2, IN_RAW).astype(jnp.bfloat16)
    h = jnp.dot(xb, w1.astype(jnp.bfloat16),
                preferred_element_type=jnp.float32) + b1
    h = jnp.maximum(h, 0.0).astype(jnp.bfloat16)
    h = jnp.dot(h, w2.astype(jnp.bfloat16),
                preferred_element_type=jnp.float32) + b2
    h = jnp.maximum(h, 0.0).astype(jnp.bfloat16)
    ref = jnp.dot(h, w3.astype(jnp.bfloat16),
                  preferred_element_type=jnp.float32) + b3
    ref = ref.astype(jnp.bfloat16).astype(jnp.float32)

    assert logits.shape == (2, 10)
    assert jnp.allclose(logits, ref, atol=1e-2, rtol=1e-2), (
        jnp.max(jnp.abs(logits - ref)))

    print("KERNEL_OK")
</pallas_src>

<mosaic_0001>
module attributes {stable_mosaic.version = 11 : i64} {
  func.func @mlp_kernel(%arg0: i32, %arg1: memref<8x784xbf16, #tpu.memory_space<vmem>>, %arg2: memref<784x512xbf16, #tpu.memory_space<vmem>>, %arg3: memref<1x512xf32, #tpu.memory_space<vmem>>, %arg4: memref<512x512xbf16, #tpu.memory_space<vmem>>, %arg5: memref<1x512xf32, #tpu.memory_space<vmem>>, %arg6: memref<512x128xbf16, #tpu.memory_space<vmem>>, %arg7: memref<1x128xf32, #tpu.memory_space<vmem>>, %arg8: memref<8x128xbf16, #tpu.memory_space<vmem>>) attributes {dimension_semantics = [#tpu.dimension_semantics<parallel>], iteration_bounds = array<i64: 1>, scalar_prefetch = 0 : i64, scratch_operands = 0 : i64, tpu.core_type = #tpu.core_type<tc>, window_params = [{transform_indices = @transform_0, window_bounds = array<i64: 8, 784>}, {pipeline_mode = #tpu.pipeline_mode<synchronous>, transform_indices = @transform_1, window_bounds = array<i64: 784, 512>}, {pipeline_mode = #tpu.pipeline_mode<synchronous>, transform_indices = @transform_2, window_bounds = array<i64: 1, 512>}, {pipeline_mode = #tpu.pipeline_mode<synchronous>, transform_indices = @transform_3, window_bounds = array<i64: 512, 512>}, {pipeline_mode = #tpu.pipeline_mode<synchronous>, transform_indices = @transform_4, window_bounds = array<i64: 1, 512>}, {pipeline_mode = #tpu.pipeline_mode<synchronous>, transform_indices = @transform_5, window_bounds = array<i64: 512, 128>}, {pipeline_mode = #tpu.pipeline_mode<synchronous>, transform_indices = @transform_6, window_bounds = array<i64: 1, 128>}, {transform_indices = @transform_7, window_bounds = array<i64: 8, 128>}]} {
    %c0 = arith.constant 0 : index
    %c0_0 = arith.constant 0 : index
    %0 = vector.load %arg1[%c0, %c0_0] : memref<8x784xbf16, #tpu.memory_space<vmem>>, vector<8x784xbf16>
    %c0_1 = arith.constant 0 : index
    %c0_2 = arith.constant 0 : index
    %1 = vector.load %arg2[%c0_1, %c0_2] : memref<784x512xbf16, #tpu.memory_space<vmem>>, vector<784x512xbf16>
    %cst = arith.constant dense<0.000000e+00> : vector<8x512xf32>
    %2 = tpu.matmul %0, %1, %cst {dimension_numbers = #tpu.dot_dimension_numbers<[1], [0], [0], [1], [0, 0, 1, 1], [], []>} : vector<8x784xbf16>, vector<784x512xbf16>, vector<8x512xf32> -> vector<8x512xf32>
    %c0_3 = arith.constant 0 : index
    %c0_4 = arith.constant 0 : index
    %3 = vector.load %arg3[%c0_3, %c0_4] : memref<1x512xf32, #tpu.memory_space<vmem>>, vector<1x512xf32>
    %4 = vector.broadcast %3 : vector<1x512xf32> to vector<8x512xf32>
    %5 = arith.addf %2, %4 : vector<8x512xf32>
    %cst_5 = arith.constant 0.000000e+00 : f32
    %6 = vector.broadcast %cst_5 : f32 to vector<8x512xf32>
    %7 = arith.maximumf %5, %6 : vector<8x512xf32>
    %8 = arith.truncf %7 : vector<8x512xf32> to vector<8x512xbf16>
    %c0_6 = arith.constant 0 : index
    %c0_7 = arith.constant 0 : index
    %9 = vector.load %arg4[%c0_6, %c0_7] : memref<512x512xbf16, #tpu.memory_space<vmem>>, vector<512x512xbf16>
    %cst_8 = arith.constant dense<0.000000e+00> : vector<8x512xf32>
    %10 = tpu.matmul %8, %9, %cst_8 {dimension_numbers = #tpu.dot_dimension_numbers<[1], [0], [0], [1], [0, 0, 1, 1], [], []>} : vector<8x512xbf16>, vector<512x512xbf16>, vector<8x512xf32> -> vector<8x512xf32>
    %c0_9 = arith.constant 0 : index
    %c0_10 = arith.constant 0 : index
    %11 = vector.load %arg5[%c0_9, %c0_10] : memref<1x512xf32, #tpu.memory_space<vmem>>, vector<1x512xf32>
    %12 = vector.broadcast %11 : vector<1x512xf32> to vector<8x512xf32>
    %13 = arith.addf %10, %12 : vector<8x512xf32>
    %cst_11 = arith.constant 0.000000e+00 : f32
    %14 = vector.broadcast %cst_11 : f32 to vector<8x512xf32>
    %15 = arith.maximumf %13, %14 : vector<8x512xf32>
    %16 = arith.truncf %15 : vector<8x512xf32> to vector<8x512xbf16>
    %c0_12 = arith.constant 0 : index
    %c0_13 = arith.constant 0 : index
    %17 = vector.load %arg6[%c0_12, %c0_13] : memref<512x128xbf16, #tpu.memory_space<vmem>>, vector<512x128xbf16>
    %cst_14 = arith.constant dense<0.000000e+00> : vector<8x128xf32>
    %18 = tpu.matmul %16, %17, %cst_14 {dimension_numbers = #tpu.dot_dimension_numbers<[1], [0], [0], [1], [0, 0, 1, 1], [], []>} : vector<8x512xbf16>, vector<512x128xbf16>, vector<8x128xf32> -> vector<8x128xf32>
    %c0_15 = arith.constant 0 : index
    %c0_16 = arith.constant 0 : index
    %19 = vector.load %arg7[%c0_15, %c0_16] : memref<1x128xf32, #tpu.memory_space<vmem>>, vector<1x128xf32>
    %20 = vector.broadcast %19 : vector<1x128xf32> to vector<8x128xf32>
    %21 = arith.addf %18, %20 : vector<8x128xf32>
    %22 = arith.truncf %21 : vector<8x128xf32> to vector<8x128xbf16>
    %c0_17 = arith.constant 0 : index
    %c0_18 = arith.constant 0 : index
    %23 = vector.load %arg8[%c0_17, %c0_18] : memref<8x128xbf16, #tpu.memory_space<vmem>>, vector<8x128xbf16>
    tpu.vector_store %arg8[%c0_17, %c0_18], %22 {strides = array<i32>} : memref<8x128xbf16, #tpu.memory_space<vmem>>, vector<8x128xbf16>,
    return
  }
  func.func @transform_0(%arg0: i32) -> (i32, i32) {
    %c0_i32 = arith.constant 0 : i32
    %c0_i32_0 = arith.constant 0 : i32
    return %arg0, %c0_i32 : i32, i32
  }
  func.func @transform_1(%arg0: i32) -> (i32, i32) {
    %c0_i32 = arith.constant 0 : i32
    %c0_i32_0 = arith.constant 0 : i32
    %c0_i32_1 = arith.constant 0 : i32
    return %c0_i32, %c0_i32_0 : i32, i32
  }
  func.func @transform_2(%arg0: i32) -> (i32, i32) {
    %c0_i32 = arith.constant 0 : i32
    %c0_i32_0 = arith.constant 0 : i32
    %c0_i32_1 = arith.constant 0 : i32
    return %c0_i32, %c0_i32_0 : i32, i32
  }
  func.func @transform_3(%arg0: i32) -> (i32, i32) {
    %c0_i32 = arith.constant 0 : i32
    %c0_i32_0 = arith.constant 0 : i32
    %c0_i32_1 = arith.constant 0 : i32
    return %c0_i32, %c0_i32_0 : i32, i32
  }
  func.func @transform_4(%arg0: i32) -> (i32, i32) {
    %c0_i32 = arith.constant 0 : i32
    %c0_i32_0 = arith.constant 0 : i32
    %c0_i32_1 = arith.constant 0 : i32
    return %c0_i32, %c0_i32_0 : i32, i32
  }
  func.func @transform_5(%arg0: i32) -> (i32, i32) {
    %c0_i32 = arith.constant 0 : i32
    %c0_i32_0 = arith.constant 0 : i32
    %c0_i32_1 = arith.constant 0 : i32
    return %c0_i32, %c0_i32_0 : i32, i32
  }
  func.func @transform_6(%arg0: i32) -> (i32, i32) {
    %c0_i32 = arith.constant 0 : i32
    %c0_i32_0 = arith.constant 0 : i32
    %c0_i32_1 = arith.constant 0 : i32
    return %c0_i32, %c0_i32_0 : i32, i32
  }
  func.func @transform_7(%arg0: i32) -> (i32, i32) {
    %c0_i32 = arith.constant 0 : i32
    %c0_i32_0 = arith.constant 0 : i32
    return %arg0, %c0_i32 : i32, i32
  }
}

</mosaic_0001>

<bundles_post_ra>
// kernel: tpu_custom_call.1
= control target key start
LH: loop header
LB: loop body
LE: loop exit
PB: predicated region body
PF: predicated region fallthrough
CT: control target
= control target key end

     0   :  { %12 = vsyncpa [#allocation3], 0  ;;  %s4208_s0 = inlined_call_operand.hbm [shape: bf16[8,784], index: 0, kind: input, shape index: {}]   ;;  %s4209_s1 = inlined_call_operand.hbm [shape: bf16[784,512], index: 1, kind: input, shape index: {}]   ;;  %s4210_s2 = inlined_call_operand.hbm [shape: f32[1,512], index: 2, kind: input, shape index: {}]   ;;  %s4211_s3 = inlined_call_operand.hbm [shape: bf16[512,512], index: 3, kind: input, shape index: {}]   ;;  %s4212_s4 = inlined_call_operand.vmem [shape: f32[1,512], index: 4, kind: input, shape index: {}]   ;;  %s4213_s5 = inlined_call_operand.hbm [shape: bf16[512,128], index: 5, kind: input, shape index: {}]   ;;  %s4214_s6 = inlined_call_operand.vmem [shape: f32[1,128], index: 6, kind: input, shape index: {}]   ;;  %s4215_s7 = inlined_call_operand.hbm [shape: bf16[8,128], index: 7, kind: output, shape index: {}]  }
   0x1   :  { %13 = vsyncpa [#allocation6], 0 }
   0x2   :  { %14 = vsyncpa [#allocation9], 0 }
   0x3   :  { %15 = vsyncpa [#allocation4], 0  ;;  %s4057_s24 = smov [#allocation5]  }
   0x4   :  { %s31_s25 = sshll.u32 %s4057_s24, 4  ;;  %s32_s25 = int_to_ptr.vmem [resolvable:$true] %s31_s25 }
   0x5   :  { %s3937_s26 = scalar_lea.vmem %s32_s25, 25088  ;;  %p3942_p1 = scmp.lt.s32.totalorder %s32_s25, %s32_s25 }
   0x6   :  { %p3938_p0 = scmp.ne.s32.totalorder %s32_s25, %s3937_s26  ;;  %p3943_p2 = scmp.lt.s32.totalorder %s3937_s26, %s3937_s26 }
   0x8   :  { %p3944_p3 = por %p3943_p2, %p3942_p1 }
   0xa   :  { %p3945_p4 = pnand %p3944_p3, %p3938_p0 }
   0xc   :  { %3948 = shalt.err (!%p3945_p4)
}
   0xd   :  { %s4058_s27 = smov 256   ;;  %s4059_s28 = smov 16  }
   0xe   :  { %37 = dma.hbm_to_vmem [thread:$0]  %s4209_s1, 25088, %s32_s25, [#allocation6], %s4058_s27, %s4058_s27, %s4059_s28  }
   0xf   :  { %s4060_s8 = smov [#allocation8]   ;;  %s4061_s10 = smov [#allocation2]  }
  0x10   :  { %s53_s9 = sshll.u32 %s4060_s8, 4  ;;  %s22_s11 = sshll.u32 %s4061_s10, 4  ;;  %s54_s9 = int_to_ptr.vmem [resolvable:$true] %s53_s9  ;;  %s23_s11 = int_to_ptr.vmem [resolvable:$true] %s22_s11 }
  0x11   :  { %s3957_s12 = scalar_lea.vmem %s54_s9, 16384  ;;  %p3962_p6 = scmp.lt.s32.totalorder %s54_s9, %s54_s9 }
  0x12   :  { %p3958_p5 = scmp.ne.s32.totalorder %s54_s9, %s3957_s12  ;;  %p3963_p7 = scmp.lt.s32.totalorder %s3957_s12, %s3957_s12 }
  0x14   :  { %p3964_p8 = por %p3963_p7, %p3962_p6 }
  0x16   :  { %p3965_p9 = pnand %p3964_p8, %p3958_p5 }
  0x18   :  { %3968 = shalt.err (!%p3965_p9)
}
  0x19   :  { %59 = dma.hbm_to_vmem [thread:$0]  %s4211_s3, 16384, %s54_s9, [#allocation9], %s4058_s27, %s4058_s27, %s4059_s28  }
  0x1a   :  { %s3977_s15 = scalar_lea.vmem %s23_s11, 448  ;;  %p3982_p11 = scmp.lt.s32.totalorder %s23_s11, %s23_s11 }
  0x1b   :  { %p3978_p10 = scmp.ne.s32.totalorder %s23_s11, %s3977_s15  ;;  %p3983_p12 = scmp.lt.s32.totalorder %s3977_s15, %s3977_s15 }
  0x1d   :  { %p3984_p13 = por %p3983_p12, %p3982_p11 }
  0x1f   :  { %p3985_p0 = pnand %p3984_p13, %p3978_p10 }
  0x21   :  { %3988 = shalt.err (!%p3985_p0)
}
  0x22   :  { %25 = dma.hbm_to_vmem [thread:$0]  %s4208_s0, 448, %s23_s11, [#allocation3]  }
  0x23   :  { %s4062_s17 = smov [#allocation7]   ;;  %s4063_s19 = smov [#allocation10]  }
  0x24   :  { %s44_s18 = sshll.u32 %s4062_s17, 4  ;;  %s67_s20 = sshll.u32 %s4063_s19, 4  ;;  %s45_s18 = int_to_ptr.vmem [resolvable:$true] %s44_s18  ;;  %s68_s20 = int_to_ptr.vmem [resolvable:$true] %s67_s20 }
  0x25   :  { %s3997_s21 = scalar_lea.vmem %s45_s18, 64  ;;  %p4002_p2 = scmp.lt.s32.totalorder %s45_s18, %s45_s18 }
  0x26   :  { %p3998_p1 = scmp.ne.s32.totalorder %s45_s18, %s3997_s21  ;;  %p4003_p3 = scmp.lt.s32.totalorder %s3997_s21, %s3997_s21 }
  0x28   :  { %p4004_p4 = por %p4003_p3, %p4002_p2 }
  0x2a   :  { %p4005_p5 = pnand %p4004_p4, %p3998_p1 }
  0x2c   :  { %4008 = shalt.err (!%p4005_p5)
}
  0x2d   :  { %47 = dma.hbm_to_vmem [thread:$0]  %s4210_s2, 64, %s45_s18, [#allocation6]  }
  0x2e   :  { %s4017_s23 = scalar_lea.vmem %s68_s20, 4096  ;;  %p4022_p7 = scmp.lt.s32.totalorder %s68_s20, %s68_s20 }
  0x2f   :  { %p4018_p6 = scmp.ne.s32.totalorder %s68_s20, %s4017_s23  ;;  %p4023_p8 = scmp.lt.s32.totalorder %s4017_s23, %s4017_s23 }
  0x31   :  { %p4024_p9 = por %p4023_p8, %p4022_p7 }
  0x33   :  { %p4025_p10 = pnand %p4024_p9, %p4018_p6 }
  0x35   :  { %4028 = shalt.err (!%p4025_p10)
}
  0x36   :  { %s4064_s0 = smov 64   ;;  %s4065_s24 = smov 4  }
  0x37   :  { %73 = dma.hbm_to_vmem [thread:$0]  %s4213_s5, 4096, %s68_s20, [#allocation9], %s4064_s0, %s4064_s0, %s4065_s24  }
  0x38   :  { %4049 = dma.done.wait [#allocation3], 448  }
  0x39   :  { %4050 = vsyncadd [#allocation3], 4294966848 }
  0x3a   :  { %4051 = dma.done.wait [#allocation6], 25152  }
  0x3b   :  { %4052 = vsyncadd [#allocation6], 4294942144 }
  0x3c   :  { %4053 = dma.done.wait [#allocation9], 20480  }
  0x3d   :  { %4054 = vsyncadd [#allocation9], 4294946816  ;;  %v3403_v0 = vld [vmem:[#allocation5 + $0xe4] ss:$16 sps:$4 sm:$0xff]   ;;  %v3407_v2 = vld [vmem:[#allocation5 + $0xe0] ss:$16 sps:$4 sm:$0xff]  }
  0x3e   :  { %v3405_v1 = vld [vmem:[#allocation5 + $0x2e4] ss:$16 sps:$4 sm:$0xff]   ;;  %1322 = vmatprep.subr.bf16.mxu0 %v3403_v0  ;;  %v3408_v3 = vld [vmem:[#allocation5 + $0x2e0] ss:$16 sps:$4 sm:$0xff]   ;;  %vm1318_vm0 = vcmask 130048   ;;  %s4067_s28 = smov [#allocation11]  }
  0x3f   :  { %1363 = vmatprep.subr.bf16.mxu1 %v3405_v1  ;;  %v3409_v4 = vld [vmem:[#allocation5 + $0xc4] ss:$16 sps:$4 sm:$0xff]   ;;  %1323 = vmatpush1.bf16.msra.mxu0 %v3407_v2  ;;  %v3413_v6 = vld [vmem:[#allocation5 + $0xc0] ss:$16 sps:$4 sm:$0xff]   ;;  %s2971_s29 = sshll.u32 %s4067_s28, 4  ;;  %s2972_s29 = int_to_ptr.vmem [resolvable:$true] %s2971_s29 }
  0x40   :  { %1364 = vmatpush1.bf16.msra.mxu1 %v3408_v3  ;;  %v3411_v5 = vld [vmem:[#allocation5 + $0x2c4] ss:$16 sps:$4 sm:$0xff]   ;;  %1324 = vmatprep.subr.bf16.mxu0 %v3409_v4  ;;  %v3414_v7 = vld [vmem:[#allocation5 + $0x2c0] ss:$16 sps:$4 sm:$0xff]   ;;  %s4029_s30 = scalar_lea.vmem %s2972_s29, 64  ;;  %p4034_p12 = scmp.lt.s32.totalorder %s2972_s29, %s2972_s29 }
  0x41   :  { %1365 = vmatprep.subr.bf16.mxu1 %v3411_v5  ;;  %v3415_v8 = vld [vmem:[#allocation5 + $0xa4] ss:$16 sps:$4 sm:$0xff]   ;;  %v3419_v10 = vld [vmem:[#allocation5 + $0xa0] ss:$16 sps:$4 sm:$0xff]   ;;  %p4030_p11 = scmp.ne.s32.totalorder %s2972_s29, %s4029_s30  ;;  %p4035_p13 = scmp.lt.s32.totalorder %s4029_s30, %s4029_s30 }
  0x42   :  { %v3417_v9 = vld [vmem:[#allocation5 + $0x2a4] ss:$16 sps:$4 sm:$0xff]   ;;  %v3420_v11 = vld [vmem:[#allocation5 + $0x2a0] ss:$16 sps:$4 sm:$0xff]  }
  0x43   :  { %1325 = vmatpush1.bf16.msra.mxu0 %v3413_v6  ;;  %v3421_v12 = vld [vmem:[#allocation5 + $0x84] ss:$16 sps:$4 sm:$0xff]   ;;  %v3425_v14 = vld [vmem:[#allocation5 + $0x80] ss:$16 sps:$4 sm:$0xff]   ;;  %p4036_p0 = por %p4035_p13, %p4034_p12 }
  0x44   :  { %1366 = vmatpush1.bf16.msra.mxu1 %v3414_v7  ;;  %1326 = vmatprep.subr.bf16.mxu0 %v3415_v8  ;;  %v3423_v13 = vld [vmem:[#allocation5 + $0x284] ss:$16 sps:$4 sm:$0xff]   ;;  %v3426_v15 = vld [vmem:[#allocation5 + $0x280] ss:$16 sps:$4 sm:$0xff]  }
  0x45   :  { %1367 = vmatprep.subr.bf16.mxu1 %v3417_v9  ;;  %v3427_v16 = vld [vmem:[#allocation5 + $0x64] ss:$16 sps:$4 sm:$0xff]   ;;  %v3431_v18 = vld [vmem:[#allocation5 + $0x60] ss:$16 sps:$4 sm:$0xff]   ;;  %p4037_p1 = pnand %p4036_p0, %p4030_p11 }
  0x46   :  { %v3429_v17 = vld [vmem:[#allocation5 + $0x264] ss:$16 sps:$4 sm:$0xff]   ;;  %v3432_v19 = vld [vmem:[#allocation5 + $0x260] ss:$16 sps:$4 sm:$0xff]  }
  0x47   :  { %1327 = vmatpush1.bf16.msra.mxu0 %v3419_v10  ;;  %v3433_v20 = vld [vmem:[#allocation5 + $0x44] ss:$16 sps:$4 sm:$0xff]   ;;  %v3437_v22 = vld [vmem:[#allocation5 + $0x40] ss:$16 sps:$4 sm:$0xff]  }
  0x48   :  { %1368 = vmatpush1.bf16.msra.mxu1 %v3420_v11  ;;  %1328 = vmatprep.subr.bf16.mxu0 %v3421_v12  ;;  %v3435_v21 = vld [vmem:[#allocation5 + $0x244] ss:$16 sps:$4 sm:$0xff]   ;;  %v3438_v23 = vld [vmem:[#allocation5 + $0x240] ss:$16 sps:$4 sm:$0xff]   ;;  %v3514_v11 = vld [vmem:[#allocation5 + $0xec] ss:$16 sps:$4 sm:$0xff]  }
  0x49   :  { %1369 = vmatprep.subr.bf16.mxu1 %v3423_v13  ;;  %v3439_v24 = vld [vmem:[#allocation5 + $0x24] ss:$16 sps:$4 sm:$0xff]   ;;  %v3443_v26 = vld [vmem:[#allocation5 + $0x20] ss:$16 sps:$4 sm:$0xff]   ;;  %v4066_v13 = vmov 0  }
  0x4a   :  { %v3441_v25 = vld [vmem:[#allocation5 + $0x224] ss:$16 sps:$4 sm:$0xff]   ;;  %v3444_v27 = vld [vmem:[#allocation5 + $0x220] ss:$16 sps:$4 sm:$0xff]  }
  0x4b   :  { %1329 = vmatpush1.bf16.msra.mxu0 %v3425_v14  ;;  %v3445_v28 = vld [vmem:[#allocation5 + $0x4] ss:$16 sps:$4 sm:$0xff]   ;;  %v3449_v30 = vld [vmem:[#allocation5] ss:$16 sps:$4 sm:$0xff]  }
  0x4c   :  { %1370 = vmatpush1.bf16.msra.mxu1 %v3426_v15  ;;  %1330 = vmatprep.subr.bf16.mxu0 %v3427_v16  ;;  %v3447_v29 = vld [vmem:[#allocation5 + $0x204] ss:$16 sps:$4 sm:$0xff]   ;;  %v3450_v31 = vld [vmem:[#allocation5 + $0x200] ss:$16 sps:$4 sm:$0xff]   ;;  %v3512_v15 = vld [vmem:[#allocation5 + $0xe8] ss:$16 sps:$4 sm:$0xff]  }
  0x4d   :  { %1371 = vmatprep.subr.bf16.mxu1 %v3429_v17  ;;  %v3451_v32 = vld [vmem:[#allocation5 + $0x1e4] ss:$16 sps:$4 sm:$0xff]   ;;  %v3455_v34 = vld [vmem:[#allocation5 + $0x1e0] ss:$16 sps:$4 sm:$0xff]   ;;  %v3518_v17 = vld [vmem:[#allocation2 + $0x18] ss:$0 sps:$4 sm:$0xff]  }
  0x4e   :  { %v3453_v33 = vld [vmem:[#allocation5 + $0x3e4] ss:$16 sps:$4 sm:$0xff]   ;;  %v3456_v35 = vld [vmem:[#allocation5 + $0x3e0] ss:$16 sps:$4 sm:$0xff]  }
  0x4f   :  { %1331 = vmatpush1.bf16.msra.mxu0 %v3431_v18  ;;  %v3457_v36 = vld [vmem:[#allocation5 + $0x1c4] ss:$16 sps:$4 sm:$0xff]   ;;  %v3461_v38 = vld [vmem:[#allocation5 + $0x1c0] ss:$16 sps:$4 sm:$0xff]   ;;  %v3521_v18 = vld [vmem:[#allocation5 + $0xcc] ss:$16 sps:$4 sm:$0xff]  }
  0x50   :  { %1372 = vmatpush1.bf16.msra.mxu1 %v3432_v19  ;;  %1332 = vmatprep.subr.bf16.mxu0 %v3433_v20  ;;  %v3459_v37 = vld [vmem:[#allocation5 + $0x3c4] ss:$16 sps:$4 sm:$0xff]   ;;  %v3462_v39 = vld [vmem:[#allocation5 + $0x3c0] ss:$16 sps:$4 sm:$0xff]   ;;  %v3519_v20 = vld [vmem:[#allocation5 + $0xc8] ss:$16 sps:$4 sm:$0xff]  }
  0x51   :  { %1373 = vmatprep.subr.bf16.mxu1 %v3435_v21  ;;  %v3463_v40 = vld [vmem:[#allocation5 + $0x1a4] ss:$16 sps:$4 sm:$0xff]   ;;  %v3467_v42 = vld [vmem:[#allocation5 + $0x1a0] ss:$16 sps:$4 sm:$0xff]  }
  0x52   :  { %v3465_v41 = vld [vmem:[#allocation5 + $0x3a4] ss:$16 sps:$4 sm:$0xff]   ;;  %v3468_v43 = vld [vmem:[#allocation5 + $0x3a0] ss:$16 sps:$4 sm:$0xff]  }
  0x53   :  { %1333 = vmatpush1.bf16.msra.mxu0 %v3437_v22  ;;  %v3469_v44 = vld [vmem:[#allocation5 + $0x184] ss:$16 sps:$4 sm:$0xff]   ;;  %v93_v48 = vld [vmem:[#allocation2 + $0x8] sm:$0xff] }
  0x54   :  { %1374 = vmatpush1.bf16.msra.mxu1 %v3438_v23  ;;  %1334 = vmatprep.subr.bf16.mxu0 %v3439_v24  ;;  %v3471_v45 = vld [vmem:[#allocation5 + $0x384] ss:$16 sps:$4 sm:$0xff]   ;;  %v3473_v49 = vld [vmem:[#allocation5 + $0x180] ss:$16 sps:$4 sm:$0xff]   ;;  %v4125_v51 = vcombine.high %v93_v48, %v93_v48  ;;  %v4131_v7 = vcombine.low %v93_v48, %v93_v48  ;;  %v3527_v22 = vld [vmem:[#allocation5 + $0xac] ss:$16 sps:$4 sm:$0xff]  }
  0x55   :  { %1375 = vmatprep.subr.bf16.mxu1 %v3441_v25  ;;  %v92_v46 = vld [vmem:[#allocation2] sm:$0xff]  ;;  %v3474_v50 = vld [vmem:[#allocation5 + $0x380] ss:$16 sps:$4 sm:$0xff]   ;;  %v3563_v48 = vld [vmem:[#allocation5 + $0x1ec] ss:$16 sps:$4 sm:$0xff]  }
  0x56   :  { %v4123_v47 = vcombine.high %v92_v46, %v92_v46  ;;  %v3475_v52 = vld [vmem:[#allocation5 + $0x164] ss:$16 sps:$4 sm:$0xff]   ;;  %1395 = vmatprep.mubr.bf16.mxu1 %v4125_v51  ;;  %v3479_v54 = vld [vmem:[#allocation5 + $0x160] ss:$16 sps:$4 sm:$0xff]   ;;  %v4129_v6 = vcombine.low %v92_v46, %v92_v46  ;;  %v3525_v24 = vld [vmem:[#allocation5 + $0xa8] ss:$16 sps:$4 sm:$0xff]  }
  0x57   :  { %1335 = vmatpush1.bf16.msra.mxu0 %v3443_v26  ;;  %v3477_v53 = vld [vmem:[#allocation5 + $0x364] ss:$16 sps:$4 sm:$0xff]   ;;  %v3480_v55 = vld [vmem:[#allocation5 + $0x360] ss:$16 sps:$4 sm:$0xff]   ;;  %v3533_v26 = vld [vmem:[#allocation5 + $0x8c] ss:$16 sps:$4 sm:$0xff]  }
  0x58   :  { %1376 = vmatpush1.bf16.msra.mxu1 %v3444_v27  ;;  %1336 = vmatprep.subr.bf16.mxu0 %v3445_v28  ;;  %v3481_v56 = vld [vmem:[#allocation5 + $0x144] ss:$16 sps:$4 sm:$0xff]   ;;  %v3485_v58 = vld [vmem:[#allocation5 + $0x140] ss:$16 sps:$4 sm:$0xff]   ;;  %v3531_v28 = vld [vmem:[#allocation5 + $0x88] ss:$16 sps:$4 sm:$0xff]  }
  0x59   :  { %1377 = vmatprep.subr.bf16.mxu1 %v3447_v29  ;;  %1354 = vmatprep.mubr.bf16.mxu0 %v4123_v47  ;;  %v3483_v57 = vld [vmem:[#allocation5 + $0x344] ss:$16 sps:$4 sm:$0xff]   ;;  %v3486_v59 = vld [vmem:[#allocation5 + $0x340] ss:$16 sps:$4 sm:$0xff]   ;;  %v3555_v46 = vld [vmem:[#allocation5 + $0x8] ss:$16 sps:$4 sm:$0xff]  }
  0x5a   :  { %v3487_v60 = vld [vmem:[#allocation5 + $0x124] ss:$16 sps:$4 sm:$0xff]   ;;  %v3491_v62 = vld [vmem:[#allocation5 + $0x120] ss:$16 sps:$4 sm:$0xff]  }
  0x5b   :  { %1337 = vmatpush1.bf16.msra.mxu0 %v3449_v30  ;;  %v3489_v61 = vld [vmem:[#allocation5 + $0x324] ss:$16 sps:$4 sm:$0xff]   ;;  %v3492_v63 = vld [vmem:[#allocation5 + $0x320] ss:$16 sps:$4 sm:$0xff]   ;;  %v3539_v30 = vld [vmem:[#allocation5 + $0x6c] ss:$16 sps:$4 sm:$0xff]  }
  0x5c   :  { %1378 = vmatpush1.bf16.msra.mxu1 %v3450_v31  ;;  %1338 = vmatprep.subr.bf16.mxu0 %v3451_v32  ;;  %v3493_v0 = vld [vmem:[#allocation5 + $0x104] ss:$16 sps:$4 sm:$0xff]   ;;  %v3497_v2 = vld [vmem:[#allocation5 + $0x100] ss:$16 sps:$4 sm:$0xff]  }
  0x5d   :  { %1379 = vmatprep.subr.bf16.mxu1 %v3453_v33  ;;  %v3495_v1 = vld [vmem:[#allocation5 + $0x304] ss:$16 sps:$4 sm:$0xff]   ;;  %v3498_v3 = vld [vmem:[#allocation5 + $0x300] ss:$16 sps:$4 sm:$0xff]  }
  0x5e   :  { %v3505_v4 = vld [vmem:[#allocation5 + $0x4e4] ss:$16 sps:$4 sm:$0xff]   ;;  %v3503_v8 = vld [vmem:[#allocation5 + $0x4e0] ss:$16 sps:$4 sm:$0xff]  }
  0x5f   :  { %1339 = vmatpush2.bf16.msra.mxu0 %v3455_v34  ;;  %v3508_v5 = vld [vmem:[#allocation5 + $0x604] ss:$16 sps:$4 sm:$0xff]   ;;  %v3506_v9 = vld [vmem:[#allocation5 + $0x600] ss:$16 sps:$4 sm:$0xff]   ;;  %v3537_v34 = vld [vmem:[#allocation5 + $0x68] ss:$16 sps:$4 sm:$0xff]  }
  0x60   :  { %1380 = vmatpush2.bf16.msra.mxu1 %v3456_v35  ;;  %1340 = vmatprep.subr.bf16.mxu0 %v3457_v36  ;;  %v3511_v10 = vld [vmem:[#allocation5 + $0x4c4] ss:$16 sps:$4 sm:$0xff]   ;;  %v3509_v12 = vld [vmem:[#allocation5 + $0x4c0] ss:$16 sps:$4 sm:$0xff]   ;;  %v3545_v36 = vld [vmem:[#allocation5 + $0x4c] ss:$16 sps:$4 sm:$0xff]  }
  0x61   :  { %1381 = vmatprep.subr.bf16.mxu1 %v3459_v37  ;;  %v3517_v14 = vld [vmem:[#allocation5 + $0x4a4] ss:$16 sps:$4 sm:$0xff]   ;;  %v3515_v16 = vld [vmem:[#allocation5 + $0x4a0] ss:$16 sps:$4 sm:$0xff]  }
  0x62   :  { %v3524_v19 = vld [vmem:[#allocation5 + $0x484] ss:$16 sps:$4 sm:$0xff]   ;;  %v3522_v21 = vld [vmem:[#allocation5 + $0x480] ss:$16 sps:$4 sm:$0xff]  }
  0x63   :  { %1341 = vmatpush2.bf16.msra.mxu0 %v3461_v38  ;;  %v3530_v23 = vld [vmem:[#allocation5 + $0x464] ss:$16 sps:$4 sm:$0xff]   ;;  %v3528_v25 = vld [vmem:[#allocation5 + $0x460] ss:$16 sps:$4 sm:$0xff]   ;;  %v3543_v38 = vld [vmem:[#allocation5 + $0x48] ss:$16 sps:$4 sm:$0xff]  }
  0x64   :  { %1382 = vmatpush2.bf16.msra.mxu1 %v3462_v39  ;;  %1342 = vmatprep.subr.bf16.mxu0 %v3463_v40  ;;  %v3536_v27 = vld [vmem:[#allocation5 + $0x444] ss:$16 sps:$4 sm:$0xff]   ;;  %v3534_v29 = vld [vmem:[#allocation5 + $0x440] ss:$16 sps:$4 sm:$0xff]   ;;  %v3551_v40 = vld [vmem:[#allocation5 + $0x2c] ss:$16 sps:$4 sm:$0xff]  }
  0x65   :  { %1383 = vmatprep.subr.bf16.mxu1 %v3465_v41  ;;  %v3542_v31 = vld [vmem:[#allocation5 + $0x424] ss:$16 sps:$4 sm:$0xff]   ;;  %v3540_v35 = vld [vmem:[#allocation5 + $0x420] ss:$16 sps:$4 sm:$0xff]  }
  0x66   :  { %v4138_v32 = vld [vmem:[#allocation2 + $0x10] sm:$0xff]  ;;  %v3546_v39 = vld [vmem:[#allocation5 + $0x400] ss:$16 sps:$4 sm:$0xff]  }
  0x67   :  { %1343 = vmatpush2.bf16.msra.mxu0 %v3467_v42  ;;  %v4142_v33 = vcombine.high %v4138_v32, %v4138_v32  ;;  %v3548_v37 = vld [vmem:[#allocation5 + $0x404] ss:$16 sps:$4 sm:$0xff]   ;;  %v3549_v42 = vld [vmem:[#allocation5 + $0x28] ss:$16 sps:$4 sm:$0xff]  }
  0x68   :  { %1384 = vmatpush2.bf16.msra.mxu1 %v3468_v43  ;;  %1344 = vmatprep.subr.bf16.mxu0 %v3469_v44  ;;  %v3554_v41 = vld [vmem:[#allocation5 + $0x5e4] ss:$16 sps:$4 sm:$0xff]   ;;  %v3552_v43 = vld [vmem:[#allocation5 + $0x5e0] ss:$16 sps:$4 sm:$0xff]   ;;  %v3557_v44 = vld [vmem:[#allocation5 + $0xc] ss:$16 sps:$4 sm:$0xff]  }
  0x69   :  { %1385 = vmatprep.subr.bf16.mxu1 %v3471_v45  ;;  %v3560_v45 = vld [vmem:[#allocation5 + $0x5c4] ss:$16 sps:$4 sm:$0xff]  }
  0x6b   :  { %1345 = vmatpush2.bf16.msra.mxu0 %v3473_v49  ;;  %v3566_v49 = vld [vmem:[#allocation5 + $0x5a4] ss:$16 sps:$4 sm:$0xff]  }
  0x6c   :  { %1386 = vmatpush2.bf16.msra.mxu1 %v3474_v50  ;;  %1346 = vmatprep.subr.bf16.mxu0 %v3475_v52  ;;  %v3561_v50 = vld [vmem:[#allocation5 + $0x1e8] ss:$16 sps:$4 sm:$0xff]   ;;  %v3564_v52 = vld [vmem:[#allocation5 + $0x5a0] ss:$16 sps:$4 sm:$0xff]  }
  0x6d   :  { %1387 = vmatprep.subr.bf16.mxu1 %v3477_v53  ;;  %v3569_v53 = vld [vmem:[#allocation5 + $0x1cc] ss:$16 sps:$4 sm:$0xff]  }
  0x6f   :  { %1347 = vmatpush2.bf16.msra.mxu0 %v3479_v54  ;;  %v3572_v54 = vld [vmem:[#allocation5 + $0x584] ss:$16 sps:$4 sm:$0xff]  }
  0x70   :  { %1388 = vmatpush2.bf16.msra.mxu1 %v3480_v55  ;;  %1348 = vmatprep.subr.bf16.mxu0 %v3481_v56  ;;  %v3567_v55 = vld [vmem:[#allocation5 + $0x1c8] ss:$16 sps:$4 sm:$0xff]   ;;  %v3570_v56 = vld [vmem:[#allocation5 + $0x580] ss:$16 sps:$4 sm:$0xff]  }
  0x71   :  { %1389 = vmatprep.subr.bf16.mxu1 %v3483_v57  ;;  %v3575_v57 = vld [vmem:[#allocation5 + $0x1ac] ss:$16 sps:$4 sm:$0xff]  }
  0x73   :  { %1349 = vmatpush2.bf16.msra.mxu0 %v3485_v58  ;;  %v3578_v58 = vld [vmem:[#allocation5 + $0x564] ss:$16 sps:$4 sm:$0xff]  }
  0x74   :  { %1390 = vmatpush2.bf16.msra.mxu1 %v3486_v59  ;;  %1350 = vmatprep.subr.bf16.mxu0 %v3487_v60  ;;  %v3573_v59 = vld [vmem:[#allocation5 + $0x1a8] ss:$16 sps:$4 sm:$0xff]   ;;  %v3576_v60 = vld [vmem:[#allocation5 + $0x560] ss:$16 sps:$4 sm:$0xff]  }
  0x75   :  { %1391 = vmatprep.subr.bf16.mxu1 %v3489_v61  ;;  %v3581_v61 = vld [vmem:[#allocation5 + $0x18c] ss:$16 sps:$4 sm:$0xff]  }
  0x77   :  { %1351 = vmatpush2.bf16.msra.mxu0 %v3491_v62  ;;  %v3584_v62 = vld [vmem:[#allocation5 + $0x544] ss:$16 sps:$4 sm:$0xff]  }
  0x78   :  { %1392 = vmatpush2.bf16.msra.mxu1 %v3492_v63  ;;  %1352 = vmatprep.subr.bf16.mxu0 %v3493_v0  ;;  %v3579_v63 = vld [vmem:[#allocation5 + $0x188] ss:$16 sps:$4 sm:$0xff]   ;;  %v3582_v0 = vld [vmem:[#allocation5 + $0x540] ss:$16 sps:$4 sm:$0xff]  }
  0x79   :  { %1393 = vmatprep.subr.bf16.mxu1 %v3495_v1  ;;  %v3587_v1 = vld [vmem:[#allocation5 + $0x16c] ss:$16 sps:$4 sm:$0xff]  }
  0x7b   :  { %1353 = vmatpush2.bf16.msra.mxu0 %v3497_v2  ;;  %v3590_v2 = vld [vmem:[#allocation5 + $0x524] ss:$16 sps:$4 sm:$0xff]  }
  0x7c   :  { %1394 = vmatpush2.bf16.msra.mxu1 %v3498_v3  ;;  %1404 = vmatprep.subr.bf16.mxu0 %v3505_v4  ;;  %v3585_v3 = vld [vmem:[#allocation5 + $0x168] ss:$16 sps:$4 sm:$0xff]   ;;  %v3588_v4 = vld [vmem:[#allocation5 + $0x520] ss:$16 sps:$4 sm:$0xff]  }
  0x7d   :  { %1459 = vmatprep.subr.bf16.mxu1 %v3508_v5  ;;  %v3593_v5 = vld [vmem:[#allocation5 + $0x14c] ss:$16 sps:$4 sm:$0xff]  }
  0x7e   :  { %1355 = vmatmul.mubr.bf16.vlgmr.msra.gmra.mxu0 %v4129_v6 }
  0x7f   :  { %1396 = vmatmul.mubr.bf16.vlgmr.msra.gmra.mxu1 %v4131_v7  ;;  %1405 = vmatpush1.bf16.msra.mxu0 %v3503_v8  ;;  %v3596_v8 = vld [vmem:[#allocation5 + $0x504] ss:$16 sps:$4 sm:$0xff]  }
  0x80   :  { %1460 = vmatpush1.bf16.msra.mxu1 %v3506_v9  ;;  %1406 = vmatprep.subr.bf16.mxu0 %v3511_v10  ;;  %v3591_v9 = vld [vmem:[#allocation5 + $0x148] ss:$16 sps:$4 sm:$0xff]   ;;  %v3594_v10 = vld [vmem:[#allocation5 + $0x500] ss:$16 sps:$4 sm:$0xff]  }
  0x81   :  { %1477 = vmatprep.mubr.bf16.mxu1 %v4066_v13  ;;  %1486 = vmatprep.subr.bf16.mxu1 %v3514_v11  ;;  %v3601_v11 = vld [vmem:[#allocation5 + $0x12c] ss:$16 sps:$4 sm:$0xff]  }
  0x82   :  { %1436 = vmatprep.mubr.bf16.mxu0 %v4142_v33 }
  0x83   :  { %1407 = vmatpush1.bf16.msra.mxu0 %v3509_v12  ;;  %v3604_v12 = vld [vmem:[#allocation5 + $0x2ec] ss:$16 sps:$4 sm:$0xff]  }
  0x84   :  { %1408 = vmatprep.subr.bf16.mxu0 %v3517_v14  ;;  %v4147_v14 = vcombine.low %v4138_v32, %v4138_v32  ;;  %v3626_v32 = vld [vmem:[#allocation5 + $0x268] ss:$16 sps:$4 sm:$0xff]  }
  0x87   :  { %3185 = vmatmul.mubr.msk.bf16.vlgmr.msra.gmra.mxu1 %vm1318_vm0, %v3518_v17  ;;  %1409 = vmatpush1.bf16.msra.mxu0 %v3515_v16  ;;  %v3602_v16 = vld [vmem:[#allocation5 + $0x2e8] ss:$16 sps:$4 sm:$0xff]   ;;  %v3607_v17 = vld [vmem:[#allocation5 + $0x10c] ss:$16 sps:$4 sm:$0xff]  }
  0x88   :  { %1487 = vmatpush1.bf16.msra.mxu1 %v3512_v15  ;;  %1410 = vmatprep.subr.bf16.mxu0 %v3524_v19  ;;  %v3599_v15 = vld [vmem:[#allocation5 + $0x128] ss:$16 sps:$4 sm:$0xff]  }
  0x89   :  { %1488 = vmatprep.subr.bf16.mxu1 %v3521_v18  ;;  %1518 = vmatprep.mubr.bf16.mxu1 %v4123_v47  ;;  %v3558_v47 = vld [vmem:[#allocation5 + $0x5c0] ss:$16 sps:$4 sm:$0xff]   ;;  %v3610_v18 = vld [vmem:[#allocation5 + $0x2cc] ss:$16 sps:$4 sm:$0xff]   ;;  %v3605_v19 = vld [vmem:[#allocation5 + $0x108] ss:$16 sps:$4 sm:$0xff]  }
  0x8b   :  { %1411 = vmatpush1.bf16.msra.mxu0 %v3522_v21  ;;  %v3613_v21 = vld [vmem:[#allocation5 + $0x4ec] ss:$16 sps:$4 sm:$0xff]  }
  0x8c   :  { %1489 = vmatpush1.bf16.msra.mxu1 %v3519_v20  ;;  %1412 = vmatprep.subr.bf16.mxu0 %v3530_v23  ;;  %v3608_v20 = vld [vmem:[#allocation5 + $0x2c8] ss:$16 sps:$4 sm:$0xff]  }
  0x8d   :  { %1490 = vmatprep.subr.bf16.mxu1 %v3527_v22  ;;  %v3616_v22 = vld [vmem:[#allocation5 + $0x2ac] ss:$16 sps:$4 sm:$0xff]   ;;  %v3611_v23 = vld [vmem:[#allocation5 + $0x4e8] ss:$16 sps:$4 sm:$0xff]  }
  0x8f   :  { %1413 = vmatpush1.bf16.msra.mxu0 %v3528_v25  ;;  %v3619_v25 = vld [vmem:[#allocation5 + $0x4cc] ss:$16 sps:$4 sm:$0xff]  }
  0x90   :  { %1491 = vmatpush1.bf16.msra.mxu1 %v3525_v24  ;;  %1414 = vmatprep.subr.bf16.mxu0 %v3536_v27  ;;  %v3614_v24 = vld [vmem:[#allocation5 + $0x2a8] ss:$16 sps:$4 sm:$0xff]  }
  0x91   :  { %1492 = vmatprep.subr.bf16.mxu1 %v3533_v26  ;;  %v3622_v26 = vld [vmem:[#allocation5 + $0x28c] ss:$16 sps:$4 sm:$0xff]   ;;  %v3617_v27 = vld [vmem:[#allocation5 + $0x4c8] ss:$16 sps:$4 sm:$0xff]  }
  0x93   :  { %1415 = vmatpush1.bf16.msra.mxu0 %v3534_v29  ;;  %v3625_v29 = vld [vmem:[#allocation5 + $0x4ac] ss:$16 sps:$4 sm:$0xff]  }
  0x94   :  { %1493 = vmatpush1.bf16.msra.mxu1 %v3531_v28  ;;  %1416 = vmatprep.subr.bf16.mxu0 %v3542_v31  ;;  %v3620_v28 = vld [vmem:[#allocation5 + $0x288] ss:$16 sps:$4 sm:$0xff]  }
  0x95   :  { %1494 = vmatprep.subr.bf16.mxu1 %v3539_v30  ;;  %v3628_v30 = vld [vmem:[#allocation5 + $0x26c] ss:$16 sps:$4 sm:$0xff]   ;;  %v3623_v31 = vld [vmem:[#allocation5 + $0x4a8] ss:$16 sps:$4 sm:$0xff]  }
  0x97   :  { %1417 = vmatpush1.bf16.msra.mxu0 %v3540_v35  ;;  %v3629_v35 = vld [vmem:[#allocation5 + $0x488] ss:$16 sps:$4 sm:$0xff]  }
  0x98   :  { %1495 = vmatpush1.bf16.msra.mxu1 %v3537_v34  ;;  %1418 = vmatprep.subr.bf16.mxu0 %v3548_v37  ;;  %v3634_v34 = vld [vmem:[#allocation5 + $0x24c] ss:$16 sps:$4 sm:$0xff]  }
  0x99   :  { %1496 = vmatprep.subr.bf16.mxu1 %v3545_v36  ;;  %v3637_v36 = vld [vmem:[#allocation5 + $0x46c] ss:$16 sps:$4 sm:$0xff]  }
  0x9a   :  { %v3640_v37 = vld [vmem:[#allocation5 + $0x22c] ss:$16 sps:$4 sm:$0xff]  }
  0x9b   :  { %1419 = vmatpush1.bf16.msra.mxu0 %v3546_v39  ;;  %v3638_v39 = vld [vmem:[#allocation5 + $0x228] ss:$16 sps:$4 sm:$0xff]  }
  0x9c   :  { %1497 = vmatpush1.bf16.msra.mxu1 %v3543_v38  ;;  %1420 = vmatprep.subr.bf16.mxu0 %v3554_v41  ;;  %v3635_v38 = vld [vmem:[#allocation5 + $0x468] ss:$16 sps:$4 sm:$0xff]  }
  0x9d   :  { %1498 = vmatprep.subr.bf16.mxu1 %v3551_v40  ;;  %v3646_v40 = vld [vmem:[#allocation5 + $0x20c] ss:$16 sps:$4 sm:$0xff]   ;;  %v3641_v41 = vld [vmem:[#allocation5 + $0x448] ss:$16 sps:$4 sm:$0xff]  }
  0x9f   :  { %1421 = vmatpush2.bf16.msra.mxu0 %v3552_v43  ;;  %v3649_v43 = vld [vmem:[#allocation5 + $0x42c] ss:$16 sps:$4 sm:$0xff]  }
  0xa0   :  { %1499 = vmatpush1.bf16.msra.mxu1 %v3549_v42  ;;  %1422 = vmatprep.subr.bf16.mxu0 %v3560_v45  ;;  %v3644_v42 = vld [vmem:[#allocation5 + $0x208] ss:$16 sps:$4 sm:$0xff]  }
  0xa1   :  { %1500 = vmatprep.subr.bf16.mxu1 %v3557_v44  ;;  %v3652_v44 = vld [vmem:[#allocation5 + $0x3ec] ss:$16 sps:$4 sm:$0xff]   ;;  %v3647_v45 = vld [vmem:[#allocation5 + $0x428] ss:$16 sps:$4 sm:$0xff]  }
  0xa3   :  { %1423 = vmatpush2.bf16.msra.mxu0 %v3558_v47  ;;  %v3655_v47 = vld [vmem:[#allocation5 + $0x40c] ss:$16 sps:$4 sm:$0xff]  }
  0xa4   :  { %1501 = vmatpush1.bf16.msra.mxu1 %v3555_v46  ;;  %1424 = vmatprep.subr.bf16.mxu0 %v3566_v49  ;;  %v3650_v46 = vld [vmem:[#allocation5 + $0x3e8] ss:$16 sps:$4 sm:$0xff]  }
  0xa5   :  { %1502 = vmatprep.subr.bf16.mxu1 %v3563_v48  ;;  %v3658_v48 = vld [vmem:[#allocation5 + $0x3cc] ss:$16 sps:$4 sm:$0xff]   ;;  %v3653_v49 = vld [vmem:[#allocation5 + $0x408] ss:$16 sps:$4 sm:$0xff]  }
  0xa7   :  { %1425 = vmatpush2.bf16.msra.mxu0 %v3564_v52  ;;  %v3661_v52 = vld [vmem:[#allocation5 + $0x5ec] ss:$16 sps:$4 sm:$0xff]  }
  0xa8   :  { %1503 = vmatpush2.bf16.msra.mxu1 %v3561_v50  ;;  %1426 = vmatprep.subr.bf16.mxu0 %v3572_v54  ;;  %v3656_v50 = vld [vmem:[#allocation5 + $0x3c8] ss:$16 sps:$4 sm:$0xff]  }
  0xa9   :  { %1504 = vmatprep.subr.bf16.mxu1 %v3569_v53  ;;  %v3664_v53 = vld [vmem:[#allocation5 + $0x3ac] ss:$16 sps:$4 sm:$0xff]   ;;  %v3659_v54 = vld [vmem:[#allocation5 + $0x5e8] ss:$16 sps:$4 sm:$0xff]  }
  0xab   :  { %1427 = vmatpush2.bf16.msra.mxu0 %v3570_v56  ;;  %v3667_v56 = vld [vmem:[#allocation5 + $0x5cc] ss:$16 sps:$4 sm:$0xff]  }
  0xac   :  { %1505 = vmatpush2.bf16.msra.mxu1 %v3567_v55  ;;  %1428 = vmatprep.subr.bf16.mxu0 %v3578_v58  ;;  %v3662_v55 = vld [vmem:[#allocation5 + $0x3a8] ss:$16 sps:$4 sm:$0xff]  }
  0xad   :  { %1506 = vmatprep.subr.bf16.mxu1 %v3575_v57  ;;  %v3670_v57 = vld [vmem:[#allocation5 + $0x38c] ss:$16 sps:$4 sm:$0xff]   ;;  %v3665_v58 = vld [vmem:[#allocation5 + $0x5c8] ss:$16 sps:$4 sm:$0xff]  }
  0xaf   :  { %1429 = vmatpush2.bf16.msra.mxu0 %v3576_v60  ;;  %v3673_v60 = vld [vmem:[#allocation5 + $0x5ac] ss:$16 sps:$4 sm:$0xff]  }
  0xb0   :  { %1507 = vmatpush2.bf16.msra.mxu1 %v3573_v59  ;;  %1430 = vmatprep.subr.bf16.mxu0 %v3584_v62  ;;  %v3668_v59 = vld [vmem:[#allocation5 + $0x388] ss:$16 sps:$4 sm:$0xff]  }
  0xb1   :  { %1508 = vmatprep.subr.bf16.mxu1 %v3581_v61  ;;  %v3676_v61 = vld [vmem:[#allocation5 + $0x36c] ss:$16 sps:$4 sm:$0xff]   ;;  %v3671_v62 = vld [vmem:[#allocation5 + $0x5a8] ss:$16 sps:$4 sm:$0xff]  }
  0xb3   :  { %1431 = vmatpush2.bf16.msra.mxu0 %v3582_v0  ;;  %v3679_v0 = vld [vmem:[#allocation5 + $0x58c] ss:$16 sps:$4 sm:$0xff]  }
  0xb4   :  { %1509 = vmatpush2.bf16.msra.mxu1 %v3579_v63  ;;  %1432 = vmatprep.subr.bf16.mxu0 %v3590_v2  ;;  %v3674_v63 = vld [vmem:[#allocation5 + $0x368] ss:$16 sps:$4 sm:$0xff]  }
  0xb5   :  { %1510 = vmatprep.subr.bf16.mxu1 %v3587_v1  ;;  %v3682_v1 = vld [vmem:[#allocation5 + $0x34c] ss:$16 sps:$4 sm:$0xff]   ;;  %v3677_v2 = vld [vmem:[#allocation5 + $0x588] ss:$16 sps:$4 sm:$0xff]  }
  0xb7   :  { %1433 = vmatpush2.bf16.msra.mxu0 %v3588_v4  ;;  %v3685_v4 = vld [vmem:[#allocation5 + $0x56c] ss:$16 sps:$4 sm:$0xff]  }
  0xb8   :  { %1511 = vmatpush2.bf16.msra.mxu1 %v3585_v3  ;;  %1434 = vmatprep.subr.bf16.mxu0 %v3596_v8  ;;  %v3680_v3 = vld [vmem:[#allocation5 + $0x348] ss:$16 sps:$4 sm:$0xff]  }
  0xb9   :  { %1512 = vmatprep.subr.bf16.mxu1 %v3593_v5  ;;  %v3688_v5 = vld [vmem:[#allocation5 + $0x32c] ss:$16 sps:$4 sm:$0xff]   ;;  %v3683_v8 = vld [vmem:[#allocation5 + $0x568] ss:$16 sps:$4 sm:$0xff]  }
  0xbb   :  { %1435 = vmatpush2.bf16.msra.mxu0 %v3594_v10  ;;  %v3691_v10 = vld [vmem:[#allocation5 + $0x54c] ss:$16 sps:$4 sm:$0xff]  }
  0xbc   :  { %1513 = vmatpush2.bf16.msra.mxu1 %v3591_v9  ;;  %1527 = vmatprep.subr.bf16.mxu0 %v3604_v12  ;;  %v3686_v9 = vld [vmem:[#allocation5 + $0x328] ss:$16 sps:$4 sm:$0xff]  }
  0xbd   :  { %1514 = vmatprep.subr.bf16.mxu1 %v3601_v11  ;;  %v3694_v11 = vld [vmem:[#allocation5 + $0x30c] ss:$16 sps:$4 sm:$0xff]   ;;  %v3689_v12 = vld [vmem:[#allocation5 + $0x548] ss:$16 sps:$4 sm:$0xff]  }
  0xbe   :  { %1437 = vmatmul.mubr.bf16.vlgmr.msra.gmra.mxu0 %v4147_v14 }
  0xbf   :  { %1528 = vmatpush1.bf16.msra.mxu0 %v3602_v16  ;;  %1559 = vmatprep.mubr.bf16.mxu0 %v4125_v51  ;;  %v3631_v51 = vld [vmem:[#allocation5 + $0x48c] ss:$16 sps:$4 sm:$0xff]  }
  0xc0   :  { %1515 = vmatpush2.bf16.msra.mxu1 %v3599_v15  ;;  %1529 = vmatprep.subr.bf16.mxu0 %v3610_v18  ;;  %v3692_v15 = vld [vmem:[#allocation5 + $0x308] ss:$16 sps:$4 sm:$0xff]   ;;  %v3697_v16 = vld [vmem:[#allocation5 + $0x52c] ss:$16 sps:$4 sm:$0xff]  }
  0xc1   :  { %1516 = vmatprep.subr.bf16.mxu1 %v3607_v17  ;;  %v3700_v17 = vld [vmem:[#allocation5 + $0x60c] ss:$16 sps:$4 sm:$0xff]   ;;  %v3695_v18 = vld [vmem:[#allocation5 + $0x528] ss:$16 sps:$4 sm:$0xff]  }
  0xc3   :  { %1530 = vmatpush1.bf16.msra.mxu0 %v3608_v20  ;;  %v3703_v20 = vld [vmem:[#allocation5 + $0x50c] ss:$16 sps:$4 sm:$0xff]  }
  0xc4   :  { %1517 = vmatpush2.bf16.msra.mxu1 %v3605_v19  ;;  %1531 = vmatprep.subr.bf16.mxu0 %v3616_v22  ;;  %v3698_v19 = vld [vmem:[#allocation5 + $0x608] ss:$16 sps:$4 sm:$0xff]  }
  0xc5   :  { %1568 = vmatprep.subr.bf16.mxu1 %v3613_v21  ;;  %v3706_v21 = vld [vmem:[#allocation8 + $0xe4] ss:$16 sps:$4 sm:$0xff]  }
  0xc6   :  { %v3701_v22 = vld [vmem:[#allocation5 + $0x508] ss:$16 sps:$4 sm:$0xff]  }
  0xc7   :  { %1519 = vmatmul.mubr.bf16.vlgmr.msra.gmra.mxu1 %v4129_v6  ;;  %1532 = vmatpush1.bf16.msra.mxu0 %v3614_v24  ;;  %v3632_v6 = vld [vmem:[#allocation5 + $0x248] ss:$16 sps:$4 sm:$0xff]  }
  0xc8   :  { %1569 = vmatpush1.bf16.msra.mxu1 %v3611_v23  ;;  %1533 = vmatprep.subr.bf16.mxu0 %v3622_v26  ;;  %v3704_v23 = vld [vmem:[#allocation8 + $0xe0] ss:$16 sps:$4 sm:$0xff]   ;;  %v3709_v24 = vld [vmem:[#allocation8 + $0xc4] ss:$16 sps:$4 sm:$0xff]   ;;  %v3928_v26 = vld [vmem:[#allocation2 + $0x18] ss:$0 sps:$4 sm:$0xff]  }
  0xc9   :  { %1570 = vmatprep.subr.bf16.mxu1 %v3619_v25  ;;  %1600 = vmatprep.mubr.bf16.mxu1 %v4142_v33  ;;  %v3643_v33 = vld [vmem:[#allocation5 + $0x44c] ss:$16 sps:$4 sm:$0xff]   ;;  %v3707_v25 = vld [vmem:[#allocation8 + $0xc0] ss:$16 sps:$4 sm:$0xff]  }
  0xcb   :  { %1534 = vmatpush1.bf16.msra.mxu0 %v3620_v28  ;;  %v3715_v28 = vld [vmem:[#allocation8 + $0x84] ss:$16 sps:$4 sm:$0xff]  }
  0xcc   :  { %1571 = vmatpush1.bf16.msra.mxu1 %v3617_v27  ;;  %1535 = vmatprep.subr.bf16.mxu0 %v3628_v30  ;;  %v3712_v27 = vld [vmem:[#allocation8 + $0xa4] ss:$16 sps:$4 sm:$0xff]  }
  0xcd   :  { %1572 = vmatprep.subr.bf16.mxu1 %v3625_v29  ;;  %v3713_v29 = vld [vmem:[#allocation8 + $0x80] ss:$16 sps:$4 sm:$0xff]   ;;  %v3760_v30 = vld [vmem:[#allocation8 + $0x2e4] ss:$16 sps:$4 sm:$0xff]  }
  0xcf   :  { %1536 = vmatpush1.bf16.msra.mxu0 %v3626_v32  ;;  %v3764_v32 = vld [vmem:[#allocation8 + $0x2c0] ss:$16 sps:$4 sm:$0xff]  }
  0xd0   :  { %1573 = vmatpush1.bf16.msra.mxu1 %v3623_v31  ;;  %1537 = vmatprep.subr.bf16.mxu0 %v3634_v34  ;;  %v3718_v31 = vld [vmem:[#allocation8 + $0x64] ss:$16 sps:$4 sm:$0xff]  }
  0xd1   :  { %1574 = vmatprep.subr.bf16.mxu1 %v3631_v51  ;;  %v3766_v51 = vld [vmem:[#allocation8 + $0x2c4] ss:$16 sps:$4 sm:$0xff]  }
  0xd2   :  { %v3721_v34 = vld [vmem:[#allocation8 + $0x44] ss:$16 sps:$4 sm:$0xff]  }
  0xd3   :  { %1538 = vmatpush1.bf16.msra.mxu0 %v3632_v6  ;;  %v3770_v6 = vld [vmem:[#allocation8 + $0x2a0] ss:$16 sps:$4 sm:$0xff]  }
  0xd4   :  { %1575 = vmatpush1.bf16.msra.mxu1 %v3629_v35  ;;  %1539 = vmatprep.subr.bf16.mxu0 %v3640_v37  ;;  %v3719_v35 = vld [vmem:[#allocation8 + $0x40] ss:$16 sps:$4 sm:$0xff]   ;;  %v3724_v37 = vld [vmem:[#allocation8 + $0x24] ss:$16 sps:$4 sm:$0xff]  }
  0xd5   :  { %1576 = vmatprep.subr.bf16.mxu1 %v3637_v36  ;;  %v3772_v36 = vld [vmem:[#allocation8 + $0x2a4] ss:$16 sps:$4 sm:$0xff]  }
  0xd7   :  { %1540 = vmatpush1.bf16.msra.mxu0 %v3638_v39  ;;  %v3776_v39 = vld [vmem:[#allocation8 + $0x280] ss:$16 sps:$4 sm:$0xff]  }
  0xd8   :  { %1577 = vmatpush1.bf16.msra.mxu1 %v3635_v38  ;;  %1541 = vmatprep.subr.bf16.mxu0 %v3646_v40  ;;  %v3722_v38 = vld [vmem:[#allocation8 + $0x20] ss:$16 sps:$4 sm:$0xff]   ;;  %v3727_v40 = vld [vmem:[#allocation8 + $0x4] ss:$16 sps:$4 sm:$0xff]  }
  0xd9   :  { %1578 = vmatprep.subr.bf16.mxu1 %v3643_v33  ;;  %v3778_v33 = vld [vmem:[#allocation8 + $0x284] ss:$16 sps:$4 sm:$0xff]  }
  0xdb   :  { %1542 = vmatpush1.bf16.msra.mxu0 %v3644_v42  ;;  %v3782_v42 = vld [vmem:[#allocation8 + $0x260] ss:$16 sps:$4 sm:$0xff]  }
  0xdc   :  { %1579 = vmatpush1.bf16.msra.mxu1 %v3641_v41  ;;  %1543 = vmatprep.subr.bf16.mxu0 %v3652_v44  ;;  %v3725_v41 = vld [vmem:[#allocation8] ss:$16 sps:$4 sm:$0xff]   ;;  %v3730_v44 = vld [vmem:[#allocation8 + $0x1e4] ss:$16 sps:$4 sm:$0xff]  }
  0xdd   :  { %1580 = vmatprep.subr.bf16.mxu1 %v3649_v43  ;;  %v3784_v43 = vld [vmem:[#allocation8 + $0x264] ss:$16 sps:$4 sm:$0xff]  }
  0xdf   :  { %1544 = vmatpush2.bf16.msra.mxu0 %v3650_v46  ;;  %v3788_v46 = vld [vmem:[#allocation8 + $0x240] ss:$16 sps:$4 sm:$0xff]  }
  0xe0   :  { %1581 = vmatpush1.bf16.msra.mxu1 %v3647_v45  ;;  %1545 = vmatprep.subr.bf16.mxu0 %v3658_v48  ;;  %v3728_v45 = vld [vmem:[#allocation8 + $0x1e0] ss:$16 sps:$4 sm:$0xff]   ;;  %v3733_v48 = vld [vmem:[#allocation8 + $0x1c4] ss:$16 sps:$4 sm:$0xff]  }
  0xe1   :  { %1582 = vmatprep.subr.bf16.mxu1 %v3655_v47  ;;  %v3790_v47 = vld [vmem:[#allocation8 + $0x244] ss:$16 sps:$4 sm:$0xff]  }
  0xe3   :  { %1546 = vmatpush2.bf16.msra.mxu0 %v3656_v50  ;;  %v3794_v50 = vld [vmem:[#allocation8 + $0x220] ss:$16 sps:$4 sm:$0xff]  }
  0xe4   :  { %1583 = vmatpush1.bf16.msra.mxu1 %v3653_v49  ;;  %1547 = vmatprep.subr.bf16.mxu0 %v3664_v53  ;;  %v3731_v49 = vld [vmem:[#allocation8 + $0x1c0] ss:$16 sps:$4 sm:$0xff]   ;;  %v3736_v53 = vld [vmem:[#allocation8 + $0x1a4] ss:$16 sps:$4 sm:$0xff]  }
  0xe5   :  { %1584 = vmatprep.subr.bf16.mxu1 %v3661_v52  ;;  %v3796_v52 = vld [vmem:[#allocation8 + $0x224] ss:$16 sps:$4 sm:$0xff]  }
  0xe7   :  { %1548 = vmatpush2.bf16.msra.mxu0 %v3662_v55  ;;  %v3800_v55 = vld [vmem:[#allocation8 + $0x200] ss:$16 sps:$4 sm:$0xff]  }
  0xe8   :  { %1585 = vmatpush2.bf16.msra.mxu1 %v3659_v54  ;;  %1549 = vmatprep.subr.bf16.mxu0 %v3670_v57  ;;  %v3734_v54 = vld [vmem:[#allocation8 + $0x1a0] ss:$16 sps:$4 sm:$0xff]   ;;  %v3739_v57 = vld [vmem:[#allocation8 + $0x184] ss:$16 sps:$4 sm:$0xff]  }
  0xe9   :  { %1586 = vmatprep.subr.bf16.mxu1 %v3667_v56  ;;  %v3802_v56 = vld [vmem:[#allocation8 + $0x204] ss:$16 sps:$4 sm:$0xff]  }
  0xeb   :  { %1550 = vmatpush2.bf16.msra.mxu0 %v3668_v59  ;;  %v3806_v59 = vld [vmem:[#allocation8 + $0x3e0] ss:$16 sps:$4 sm:$0xff]  }
  0xec   :  { %1587 = vmatpush2.bf16.msra.mxu1 %v3665_v58  ;;  %1551 = vmatprep.subr.bf16.mxu0 %v3676_v61  ;;  %v3737_v58 = vld [vmem:[#allocation8 + $0x180] ss:$16 sps:$4 sm:$0xff]   ;;  %v3742_v61 = vld [vmem:[#allocation8 + $0x164] ss:$16 sps:$4 sm:$0xff]  }
  0xed   :  { %1588 = vmatprep.subr.bf16.mxu1 %v3673_v60  ;;  %v3808_v60 = vld [vmem:[#allocation8 + $0x3e4] ss:$16 sps:$4 sm:$0xff]  }
  0xef   :  { %1552 = vmatpush2.bf16.msra.mxu0 %v3674_v63  ;;  %v3812_v63 = vld [vmem:[#allocation8 + $0x3c0] ss:$16 sps:$4 sm:$0xff]  }
  0xf0   :  { %1589 = vmatpush2.bf16.msra.mxu1 %v3671_v62  ;;  %1553 = vmatprep.subr.bf16.mxu0 %v3682_v1  ;;  %v3740_v62 = vld [vmem:[#allocation8 + $0x160] ss:$16 sps:$4 sm:$0xff]   ;;  %v3745_v1 = vld [vmem:[#allocation8 + $0x144] ss:$16 sps:$4 sm:$0xff]  }
  0xf1   :  { %1590 = vmatprep.subr.bf16.mxu1 %v3679_v0  ;;  %v3814_v0 = vld [vmem:[#allocation8 + $0x3c4] ss:$16 sps:$4 sm:$0xff]  }
  0xf3   :  { %1554 = vmatpush2.bf16.msra.mxu0 %v3680_v3  ;;  %v3818_v3 = vld [vmem:[#allocation8 + $0x3a0] ss:$16 sps:$4 sm:$0xff]  }
  0xf4   :  { %1591 = vmatpush2.bf16.msra.mxu1 %v3677_v2  ;;  %1555 = vmatprep.subr.bf16.mxu0 %v3688_v5  ;;  %v3743_v2 = vld [vmem:[#allocation8 + $0x140] ss:$16 sps:$4 sm:$0xff]   ;;  %v3748_v5 = vld [vmem:[#allocation8 + $0x124] ss:$16 sps:$4 sm:$0xff]  }
  0xf5   :  { %1592 = vmatprep.subr.bf16.mxu1 %v3685_v4  ;;  %v3820_v4 = vld [vmem:[#allocation8 + $0x3a4] ss:$16 sps:$4 sm:$0xff]  }
  0xf7   :  { %1556 = vmatpush2.bf16.msra.mxu0 %v3686_v9  ;;  %v3824_v9 = vld [vmem:[#allocation8 + $0x380] ss:$16 sps:$4 sm:$0xff]  }
  0xf8   :  { %1593 = vmatpush2.bf16.msra.mxu1 %v3683_v8  ;;  %1557 = vmatprep.subr.bf16.mxu0 %v3694_v11  ;;  %v3746_v8 = vld [vmem:[#allocation8 + $0x120] ss:$16 sps:$4 sm:$0xff]   ;;  %v3751_v11 = vld [vmem:[#allocation8 + $0x104] ss:$16 sps:$4 sm:$0xff]  }
  0xf9   :  { %1594 = vmatprep.subr.bf16.mxu1 %v3691_v10  ;;  %v3826_v10 = vld [vmem:[#allocation8 + $0x384] ss:$16 sps:$4 sm:$0xff]  }
  0xfb   :  { %1558 = vmatpush2.bf16.msra.mxu0 %v3692_v15 }
  0xfc   :  { %1595 = vmatpush2.bf16.msra.mxu1 %v3689_v12  ;;  %1623 = vmatprep.subr.bf16.mxu0 %v3700_v17  ;;  %v3832_v17 = vld [vmem:[#allocation8 + $0x364] ss:$16 sps:$4 sm:$0xff]  }
  0xfd   :  { %1596 = vmatprep.subr.bf16.mxu1 %v3697_v16  ;;  %v3749_v16 = vld [vmem:[#allocation8 + $0x100] ss:$16 sps:$4 sm:$0xff]  }
  0xfe   :  { %1560 = vmatmul.mubr.bf16.vlgmr.msra.gmra.mxu0 %v4131_v7  ;;  %v3710_v7 = vld [vmem:[#allocation8 + $0xa0] ss:$16 sps:$4 sm:$0xff]  }
  0xff   :  { %1624 = vmatpush1.bf16.msra.mxu0 %v3698_v19  ;;  %1641 = vmatprep.mubr.bf16.mxu0 %v4066_v13  ;;  %v3758_v13 = vld [vmem:[#allocation8 + $0x2e0] ss:$16 sps:$4 sm:$0xff]  }
 0x100   :  { %1597 = vmatpush2.bf16.msra.mxu1 %v3695_v18  ;;  %2448 = vmatprep.subr.bf16.mxu0 %v3706_v21  ;;  %v3830_v21 = vld [vmem:[#allocation8 + $0x360] ss:$16 sps:$4 sm:$0xff]  }
 0x101   :  { %1598 = vmatprep.subr.bf16.mxu1 %v3703_v20  ;;  %v3754_v20 = vld [vmem:[#allocation8 + $0xec] ss:$16 sps:$4 sm:$0xff]  }
 0x104   :  { %1599 = vmatpush2.bf16.msra.mxu1 %v3701_v22 }
 0x105   :  { %2489 = vmatprep.subr.bf16.mxu1 %v3760_v30 }
 0x106   :  { %3186 = vmatmul.mubr.msk.bf16.vlgmr.msra.gmra.mxu0 %vm1318_vm0, %v3928_v26 }
 0x107   :  { %1601 = vmatmul.mubr.bf16.vlgmr.msra.gmra.mxu1 %v4147_v14  ;;  %2449 = vmatpush1.bf16.msra.mxu0 %v3704_v23  ;;  %v3716_v14 = vld [vmem:[#allocation8 + $0x60] ss:$16 sps:$4 sm:$0xff]  }
 0x108   :  { %2450 = vmatprep.subr.bf16.mxu0 %v3709_v24  ;;  %2490 = vmatpush1.bf16.msra.mxu1 %v3758_v13  ;;  %v3838_v24 = vld [vmem:[#allocation8 + $0x344] ss:$16 sps:$4 sm:$0xff]   ;;  %v3842_v13 = vld [vmem:[#allocation8 + $0x320] ss:$16 sps:$4 sm:$0xff]  }
 0x109   :  { %2491 = vmatprep.subr.bf16.mxu1 %v3766_v51  ;;  %v3850_v51 = vld [vmem:[#allocation8 + $0x2ec] ss:$16 sps:$4 sm:$0xff]  }
 0x10b   :  { %2451 = vmatpush1.bf16.msra.mxu0 %v3707_v25 }
 0x10c   :  { %2452 = vmatprep.subr.bf16.mxu0 %v3712_v27  ;;  %2492 = vmatpush1.bf16.msra.mxu1 %v3764_v32  ;;  %v3836_v27 = vld [vmem:[#allocation8 + $0x340] ss:$16 sps:$4 sm:$0xff]  }
 0x10d   :  { %2493 = vmatprep.subr.bf16.mxu1 %v3772_v36  ;;  %v3845_v32 = vld [vmem:[#allocation8 + $0x300] ss:$16 sps:$4 sm:$0xff]   ;;  %v4160_v36 = vld [vmem:[#allocation7] sm:$0xf] }
 0x10f   :  { %2453 = vmatpush1.bf16.msra.mxu0 %v3710_v7 }
 0x110   :  { %2454 = vmatprep.subr.bf16.mxu0 %v3715_v28  ;;  %2494 = vmatpush1.bf16.msra.mxu1 %v3770_v6  ;;  %v3844_v28 = vld [vmem:[#allocation8 + $0x324] ss:$16 sps:$4 sm:$0xff]  }
 0x111   :  { %2495 = vmatprep.subr.bf16.mxu1 %v3778_v33 }
 0x113   :  { %2455 = vmatpush1.bf16.msra.mxu0 %v3713_v29 }
 0x114   :  { %2456 = vmatprep.subr.bf16.mxu0 %v3718_v31  ;;  %2496 = vmatpush1.bf16.msra.mxu1 %v3776_v39  ;;  %v3847_v31 = vld [vmem:[#allocation8 + $0x304] ss:$16 sps:$4 sm:$0xff]  }
 0x115   :  { %2497 = vmatprep.subr.bf16.mxu1 %v3784_v43 }
 0x117   :  { %2457 = vmatpush1.bf16.msra.mxu0 %v3716_v14 }
 0x118   :  { %2458 = vmatprep.subr.bf16.mxu0 %v3721_v34  ;;  %2498 = vmatpush1.bf16.msra.mxu1 %v3782_v42  ;;  %v294_v34 = vlaneseq }
 0x119   :  { %2499 = vmatprep.subr.bf16.mxu1 %v3790_v47 }
 0x11b   :  { %2459 = vmatpush1.bf16.msra.mxu0 %v3719_v35  ;;  %v4157_v35 = vshrl.u32 %v294_v34, 7 }
 0x11c   :  { %2460 = vmatprep.subr.bf16.mxu0 %v3724_v37  ;;  %2500 = vmatpush1.bf16.msra.mxu1 %v3788_v46 }
 0x11d   :  { %2501 = vmatprep.subr.bf16.mxu1 %v3796_v52  ;;  %v296_v6 = vsub.s32 0, %v4157_v35  ;;  %v300_v37 = vsub.s32 1, %v4157_v35 }
 0x11f   :  { %2461 = vmatpush1.bf16.msra.mxu0 %v3722_v38  ;;  %v297_v38 = vrot.slane %v4160_v36, %v296_v6  ;;  %v301_v39 = vrot.slane %v4160_v36, %v300_v37 }
 0x120   :  { %2462 = vmatprep.subr.bf16.mxu0 %v3727_v40  ;;  %2502 = vmatpush1.bf16.msra.mxu1 %v3794_v50 }
 0x121   :  { %2503 = vmatprep.subr.bf16.mxu1 %v3802_v56  ;;  %v3752_v56 = vld [vmem:[#allocation8 + $0xe8] ss:$16 sps:$4 sm:$0xff]  }
 0x123   :  { %2463 = vmatpush1.bf16.msra.mxu0 %v3725_v41 }
 0x124   :  { %2464 = vmatprep.subr.bf16.mxu0 %v3730_v44  ;;  %2504 = vmatpush1.bf16.msra.mxu1 %v3800_v55 }
 0x125   :  { %2505 = vmatprep.subr.bf16.mxu1 %v3808_v60 }
 0x127   :  { %2465 = vmatpush2.bf16.msra.mxu0 %v3728_v45 }
 0x128   :  { %2466 = vmatprep.subr.bf16.mxu0 %v3733_v48  ;;  %2506 = vmatpush2.bf16.msra.mxu1 %v3806_v59  ;;  %v3757_v59 = vld [vmem:[#allocation8 + $0xcc] ss:$16 sps:$4 sm:$0xff]  }
 0x129   :  { %2507 = vmatprep.subr.bf16.mxu1 %v3814_v0  ;;  %v3761_v0 = vld [vmem:[#allocation8 + $0xa8] ss:$16 sps:$4 sm:$0xff]  }
 0x12b   :  { %2467 = vmatpush2.bf16.msra.mxu0 %v3731_v49 }
 0x12c   :  { %2468 = vmatprep.subr.bf16.mxu0 %v3736_v53  ;;  %2508 = vmatpush2.bf16.msra.mxu1 %v3812_v63  ;;  %v3763_v63 = vld [vmem:[#allocation8 + $0xac] ss:$16 sps:$4 sm:$0xff]  }
 0x12d   :  { %2509 = vmatprep.subr.bf16.mxu1 %v3820_v4  ;;  %v3773_v4 = vld [vmem:[#allocation8 + $0x68] ss:$16 sps:$4 sm:$0xff]  }
 0x12f   :  { %2469 = vmatpush2.bf16.msra.mxu0 %v3734_v54 }
 0x130   :  { %2470 = vmatprep.subr.bf16.mxu0 %v3739_v57  ;;  %2510 = vmatpush2.bf16.msra.mxu1 %v3818_v3  ;;  %v3775_v3 = vld [vmem:[#allocation8 + $0x6c] ss:$16 sps:$4 sm:$0xff]  }
 0x131   :  { %2511 = vmatprep.subr.bf16.mxu1 %v3826_v10  ;;  %v3785_v10 = vld [vmem:[#allocation8 + $0x28] ss:$16 sps:$4 sm:$0xff]  }
 0x133   :  { %2471 = vmatpush2.bf16.msra.mxu0 %v3737_v58 }
 0x134   :  { %2472 = vmatprep.subr.bf16.mxu0 %v3742_v61  ;;  %2512 = vmatpush2.bf16.msra.mxu1 %v3824_v9  ;;  %v3755_v61 = vld [vmem:[#allocation8 + $0xc8] ss:$16 sps:$4 sm:$0xff]   ;;  %v3787_v9 = vld [vmem:[#allocation8 + $0x2c] ss:$16 sps:$4 sm:$0xff]  }
 0x135   :  { %2513 = vmatprep.subr.bf16.mxu1 %v3832_v17  ;;  %v3805_v17 = vld [vmem:[#allocation8 + $0x1cc] ss:$16 sps:$4 sm:$0xff]  }
 0x137   :  { %2473 = vmatpush2.bf16.msra.mxu0 %v3740_v62 }
 0x138   :  { %2474 = vmatprep.subr.bf16.mxu0 %v3745_v1  ;;  %2514 = vmatpush2.bf16.msra.mxu1 %v3830_v21  ;;  %v3769_v1 = vld [vmem:[#allocation8 + $0x8c] ss:$16 sps:$4 sm:$0xff]  }
 0x139   :  { %2515 = vmatprep.subr.bf16.mxu1 %v3838_v24  ;;  %v3817_v21 = vld [vmem:[#allocation8 + $0x18c] ss:$16 sps:$4 sm:$0xff]   ;;  %v3821_v24 = vld [vmem:[#allocation8 + $0x168] ss:$16 sps:$4 sm:$0xff]  }
 0x13b   :  { %2475 = vmatpush2.bf16.msra.mxu0 %v3743_v2  ;;  %v3767_v2 = vld [vmem:[#allocation8 + $0x88] ss:$16 sps:$4 sm:$0xff]  }
 0x13c   :  { %2476 = vmatprep.subr.bf16.mxu0 %v3748_v5  ;;  %2516 = vmatpush2.bf16.msra.mxu1 %v3836_v27  ;;  %v3781_v5 = vld [vmem:[#allocation8 + $0x4c] ss:$16 sps:$4 sm:$0xff]   ;;  %v3827_v27 = vld [vmem:[#allocation8 + $0x148] ss:$16 sps:$4 sm:$0xff]  }
 0x13d   :  { %2517 = vmatprep.subr.bf16.mxu1 %v3844_v28  ;;  %v308_v28 = vsub.s32 3, %v4157_v35 }
 0x13e   :  { %v1356_v12 = vpop.f32.mrf.mxu0 }
 0x13f   :  { %v1397_v15 = vpop.f32.mrf.mxu1  ;;  %2477 = vmatpush2.bf16.msra.mxu0 %v3746_v8  ;;  %v1357_v33 = vadd.f32 %v1356_v12, %v297_v38  ;;  %v3779_v8 = vld [vmem:[#allocation8 + $0x48] ss:$16 sps:$4 sm:$0xff]  }
 0x140   :  { %v1358_v18 = vpop.f32.mrf.mxu0  ;;  %2478 = vmatprep.subr.bf16.mxu0 %v3751_v11  ;;  %2518 = vmatpush2.bf16.msra.mxu1 %v3842_v13  ;;  %v3793_v11 = vld [vmem:[#allocation8 + $0xc] ss:$16 sps:$4 sm:$0xff]   ;;  %v3791_v12 = vld [vmem:[#allocation8 + $0x8] ss:$16 sps:$4 sm:$0xff]  }
 0x141   :  { %v1399_v19 = vpop.f32.mrf.mxu1  ;;  %2519 = vmatprep.subr.bf16.mxu1 %v3847_v31  ;;  %v1359_v40 = vadd.f32 %v1358_v18, %v301_v39  ;;  %v1398_v41 = vadd.f32 %v1397_v15, %v1357_v33  ;;  %v3799_v15 = vld [vmem:[#allocation8 + $0x1ec] ss:$16 sps:$4 sm:$0xff]   ;;  %v3803_v18 = vld [vmem:[#allocation8 + $0x1c8] ss:$16 sps:$4 sm:$0xff]  }
 0x142   :  { %v1360_v22 = vpop.f32.mrf.mxu0  ;;  %v3839_v38 = vld [vmem:[#allocation8 + $0x108] ss:$16 sps:$4 sm:$0xff]  }
 0x143   :  { %v1401_v23 = vpop.f32.mrf.mxu1  ;;  %2479 = vmatpush2.bf16.msra.mxu0 %v3749_v16  ;;  %v1400_v43 = vadd.f32 %v1399_v19, %v1359_v40  ;;  %v3797_v16 = vld [vmem:[#allocation8 + $0x1e8] ss:$16 sps:$4 sm:$0xff]   ;;  %v3811_v19 = vld [vmem:[#allocation8 + $0x1ac] ss:$16 sps:$4 sm:$0xff]  }
 0x144   :  { %v1361_v25 = vpop.f32.mrf.mxu0  ;;  %2530 = vmatprep.subr.bf16.mxu0 %v3754_v20  ;;  %2520 = vmatpush2.bf16.msra.mxu1 %v3845_v32  ;;  %v3809_v20 = vld [vmem:[#allocation8 + $0x1a8] ss:$16 sps:$4 sm:$0xff]   ;;  %v3823_v23 = vld [vmem:[#allocation8 + $0x16c] ss:$16 sps:$4 sm:$0xff]   ;;  %v309_v32 = vrot.slane %v4160_v36, %v308_v28 }
 0x145   :  { %v1402_v26 = vpop.f32.mrf.mxu1  ;;  %2571 = vmatprep.subr.bf16.mxu1 %v3850_v51  ;;  %v3815_v22 = vld [vmem:[#allocation8 + $0x188] ss:$16 sps:$4 sm:$0xff]   ;;  %v3829_v25 = vld [vmem:[#allocation8 + $0x14c] ss:$16 sps:$4 sm:$0xff]  }
 0x146   :  { %v304_v26 = vsub.s32 2, %v4157_v35 }
 0x147   :  { %v1479_v7 = vpop.f32.mrf.mxu1 }
 0x148   :  { %v305_v13 = vrot.slane %v4160_v36, %v304_v26 }
 0x149   :  { %v1481_v29 = vpop.f32.mrf.mxu1 }
 0x14b   :  { %v1483_v30 = vpop.f32.mrf.mxu1 }
 0x14c   :  { %v3833_v30 = vld [vmem:[#allocation8 + $0x128] ss:$16 sps:$4 sm:$0xff]  }
 0x14d   :  { %v1484_v14 = vpop.f32.mrf.mxu1 }
 0x14e   :  { %v3841_v14 = vld [vmem:[#allocation8 + $0x10c] ss:$16 sps:$4 sm:$0xff]  }
 0x17e   :  { %v1438_v42 = vpop.f32.mrf.mxu0 }
 0x17f   :  { %v1439_v44 = vadd.f32 %v1438_v42, %v1398_v41 }
 0x180   :  { %v1440_v45 = vpop.f32.mrf.mxu0 }
 0x181   :  { %v1480_v46 = vadd.f32 %v1479_v7, %v1439_v44  ;;  %v1441_v47 = vadd.f32 %v1440_v45, %v1400_v43  ;;  %v3835_v7 = vld [vmem:[#allocation8 + $0x12c] ss:$16 sps:$4 sm:$0xff]  }
 0x182   :  { %v1442_v48 = vpop.f32.mrf.mxu0 }
 0x183   :  { %v1482_v49 = vadd.f32 %v1481_v29, %v1441_v47  ;;  %v1650_v50 = vmax.f32 %v1480_v46, 0.0 }
 0x184   :  { %v1443_v52 = vpop.f32.mrf.mxu0 }
 0x185   :  { %v1651_v53 = vmax.f32 %v1482_v49, 0.0  ;;  %v4171_v57 = vpack.c.bf16 %v1650_v50, %v1650_v50 }
 0x187   :  { %v4169_v54 = vpop.f32.mrf.mxu1  ;;  %v1655_v55 = vpack.c.bf16 %v1651_v53, %v1651_v53 }
 0x188   :  { %v1521_v34 = vadd.f32 %v4169_v54, %v305_v13  ;;  %v3886_v13 = vld [vmem:[#allocation8 + $0x36c] ss:$16 sps:$4 sm:$0xff]  }
 0x189   :  { %v4173_v58 = vpop.f32.mrf.mxu1  ;;  %2480 = vmatprep.mubr.bf16.mxu0 %v1655_v55 }
 0x18a   :  { %2481 = vmatmul.mubr.bf16.vlgmr.msra.gmra.mxu0 %v4171_v57  ;;  %v1523_v33 = vadd.f32 %v4173_v58, %v309_v32  ;;  %v3848_v58 = vld [vmem:[#allocation8 + $0x2e8] ss:$16 sps:$4 sm:$0xff]   ;;  %v3892_v32 = vld [vmem:[#allocation8 + $0x32c] ss:$16 sps:$4 sm:$0xff]  }
 0x18b   :  { %v1524_v60 = vpop.f32.mrf.mxu1  ;;  %2531 = vmatpush1.bf16.msra.mxu0 %v3752_v56  ;;  %2562 = vmatprep.mubr.bf16.mxu0 %v1655_v55 }
 0x18c   :  { %2532 = vmatprep.subr.bf16.mxu0 %v3757_v59  ;;  %v3853_v60 = vld [vmem:[#allocation8 + $0x2cc] ss:$16 sps:$4 sm:$0xff]  }
 0x18d   :  { %v1525_v62 = vpop.f32.mrf.mxu1 }
 0x18e   :  { %v3897_v62 = vld [vmem:[#allocation10 + $0x38] sm:$0xff]  }
 0x18f   :  { %2533 = vmatpush1.bf16.msra.mxu0 %v3755_v61  ;;  %v3896_v61 = vld [vmem:[#allocation10 + $0x78] sm:$0xff]  }
 0x190   :  { %2534 = vmatprep.subr.bf16.mxu0 %v3763_v63  ;;  %v3898_v63 = vld [vmem:[#allocation10 + $0x70] sm:$0xff]  }
 0x193   :  { %2535 = vmatpush1.bf16.msra.mxu0 %v3761_v0  ;;  %v3856_v0 = vld [vmem:[#allocation8 + $0x2ac] ss:$16 sps:$4 sm:$0xff]  }
 0x194   :  { %2536 = vmatprep.subr.bf16.mxu0 %v3769_v1  ;;  %v3899_v1 = vld [vmem:[#allocation10 + $0x30] sm:$0xff]  }
 0x197   :  { %2537 = vmatpush1.bf16.msra.mxu0 %v3767_v2  ;;  %v3900_v2 = vld [vmem:[#allocation10 + $0x68] sm:$0xff]  }
 0x198   :  { %2538 = vmatprep.subr.bf16.mxu0 %v3775_v3  ;;  %v3854_v3 = vld [vmem:[#allocation8 + $0x2a8] ss:$16 sps:$4 sm:$0xff]  }
 0x19b   :  { %2539 = vmatpush1.bf16.msra.mxu0 %v3773_v4  ;;  %v3859_v4 = vld [vmem:[#allocation8 + $0x28c] ss:$16 sps:$4 sm:$0xff]  }
 0x19c   :  { %2540 = vmatprep.subr.bf16.mxu0 %v3781_v5  ;;  %v3901_v5 = vld [vmem:[#allocation10 + $0x28] sm:$0xff]  }
 0x19f   :  { %2541 = vmatpush1.bf16.msra.mxu0 %v3779_v8  ;;  %v3902_v8 = vld [vmem:[#allocation10 + $0x60] sm:$0xff]  }
 0x1a0   :  { %2542 = vmatprep.subr.bf16.mxu0 %v3787_v9  ;;  %v3857_v9 = vld [vmem:[#allocation8 + $0x288] ss:$16 sps:$4 sm:$0xff]  }
 0x1a3   :  { %2543 = vmatpush1.bf16.msra.mxu0 %v3785_v10  ;;  %v3862_v10 = vld [vmem:[#allocation8 + $0x26c] ss:$16 sps:$4 sm:$0xff]  }
 0x1a4   :  { %2544 = vmatprep.subr.bf16.mxu0 %v3793_v11  ;;  %v3903_v11 = vld [vmem:[#allocation10 + $0x20] sm:$0xff]  }
 0x1a7   :  { %2545 = vmatpush1.bf16.msra.mxu0 %v3791_v12  ;;  %v3860_v12 = vld [vmem:[#allocation8 + $0x268] ss:$16 sps:$4 sm:$0xff]  }
 0x1a8   :  { %2546 = vmatprep.subr.bf16.mxu0 %v3799_v15  ;;  %v3865_v15 = vld [vmem:[#allocation8 + $0x24c] ss:$16 sps:$4 sm:$0xff]  }
 0x1ab   :  { %2547 = vmatpush2.bf16.msra.mxu0 %v3797_v16  ;;  %v3863_v16 = vld [vmem:[#allocation8 + $0x248] ss:$16 sps:$4 sm:$0xff]  }
 0x1ac   :  { %2548 = vmatprep.subr.bf16.mxu0 %v3805_v17  ;;  %v3868_v17 = vld [vmem:[#allocation8 + $0x22c] ss:$16 sps:$4 sm:$0xff]  }
 0x1af   :  { %2549 = vmatpush2.bf16.msra.mxu0 %v3803_v18  ;;  %v3866_v18 = vld [vmem:[#allocation8 + $0x228] ss:$16 sps:$4 sm:$0xff]  }
 0x1b0   :  { %2550 = vmatprep.subr.bf16.mxu0 %v3811_v19  ;;  %v3871_v19 = vld [vmem:[#allocation8 + $0x20c] ss:$16 sps:$4 sm:$0xff]  }
 0x1b3   :  { %2551 = vmatpush2.bf16.msra.mxu0 %v3809_v20  ;;  %v3869_v20 = vld [vmem:[#allocation8 + $0x208] ss:$16 sps:$4 sm:$0xff]  }
 0x1b4   :  { %2552 = vmatprep.subr.bf16.mxu0 %v3817_v21  ;;  %v3874_v21 = vld [vmem:[#allocation8 + $0x3ec] ss:$16 sps:$4 sm:$0xff]  }
 0x1b7   :  { %2553 = vmatpush2.bf16.msra.mxu0 %v3815_v22  ;;  %v3872_v22 = vld [vmem:[#allocation8 + $0x3e8] ss:$16 sps:$4 sm:$0xff]  }
 0x1b8   :  { %2554 = vmatprep.subr.bf16.mxu0 %v3823_v23  ;;  %v3877_v23 = vld [vmem:[#allocation8 + $0x3cc] ss:$16 sps:$4 sm:$0xff]  }
 0x1bb   :  { %2555 = vmatpush2.bf16.msra.mxu0 %v3821_v24  ;;  %v3875_v24 = vld [vmem:[#allocation8 + $0x3c8] ss:$16 sps:$4 sm:$0xff]  }
 0x1bc   :  { %2556 = vmatprep.subr.bf16.mxu0 %v3829_v25  ;;  %v3880_v25 = vld [vmem:[#allocation8 + $0x3ac] ss:$16 sps:$4 sm:$0xff]  }
 0x1be   :  { %v1561_v29 = vpop.f32.mrf.mxu0 }
 0x1bf   :  { %2557 = vmatpush2.bf16.msra.mxu0 %v3827_v27  ;;  %v1562_v40 = vadd.f32 %v1561_v29, %v1521_v34  ;;  %v3878_v27 = vld [vmem:[#allocation8 + $0x3a8] ss:$16 sps:$4 sm:$0xff]   ;;  %v3895_v34 = vld [vmem:[#allocation8 + $0x30c] ss:$16 sps:$4 sm:$0xff]  }
 0x1c0   :  { %v1563_v31 = vpop.f32.mrf.mxu0  ;;  %2558 = vmatprep.subr.bf16.mxu0 %v3835_v7  ;;  %v3883_v7 = vld [vmem:[#allocation8 + $0x38c] ss:$16 sps:$4 sm:$0xff]   ;;  %v3881_v29 = vld [vmem:[#allocation8 + $0x388] ss:$16 sps:$4 sm:$0xff]  }
 0x1c1   :  { %v1564_v43 = vadd.f32 %v1563_v31, %v1523_v33  ;;  %v3889_v31 = vld [vmem:[#allocation8 + $0x34c] ss:$16 sps:$4 sm:$0xff]  }
 0x1c2   :  { %v1565_v51 = vpop.f32.mrf.mxu0  ;;  %v3905_v33 = vld [vmem:[#allocation10 + $0x18] sm:$0xff]  }
 0x1c3   :  { %2559 = vmatpush2.bf16.msra.mxu0 %v3833_v30  ;;  %v3884_v30 = vld [vmem:[#allocation8 + $0x368] ss:$16 sps:$4 sm:$0xff]  }
 0x1c4   :  { %v1566_v39 = vpop.f32.mrf.mxu0  ;;  %2560 = vmatprep.subr.bf16.mxu0 %v3841_v14  ;;  %v3887_v14 = vld [vmem:[#allocation8 + $0x348] ss:$16 sps:$4 sm:$0xff]  }
 0x1c5   :  { %v3890_v51 = vld [vmem:[#allocation8 + $0x328] ss:$16 sps:$4 sm:$0xff]  }
 0x1c6   :  { %v1643_v42 = vpop.f32.mrf.mxu0  ;;  %v3904_v39 = vld [vmem:[#allocation10 + $0x58] sm:$0xff]  }
 0x1c7   :  { %v1602_v41 = vpop.f32.mrf.mxu1  ;;  %2561 = vmatpush2.bf16.msra.mxu0 %v3839_v38  ;;  %v3893_v38 = vld [vmem:[#allocation8 + $0x308] ss:$16 sps:$4 sm:$0xff]  }
 0x1c8   :  { %v1603_v44 = vadd.f32 %v1602_v41, %v1562_v40  ;;  %v1645_v46 = vpop.f32.mrf.mxu0  ;;  %3348 = vmatprep.subr.bf16.mxu0 %v3896_v61  ;;  %v3906_v40 = vld [vmem:[#allocation10 + $0x50] sm:$0xff]  }
 0x1c9   :  { %v1604_v45 = vpop.f32.mrf.mxu1  ;;  %v3907_v41 = vld [vmem:[#allocation10 + $0x10] sm:$0xff]  }
 0x1ca   :  { %v1644_v47 = vadd.f32 %v1643_v42, %v1603_v44  ;;  %v1605_v48 = vadd.f32 %v1604_v45, %v1564_v43  ;;  %2563 = vmatmul.mubr.bf16.vlgmr.msra.gmra.mxu0 %v4171_v57  ;;  %v1647_v49 = vpop.f32.mrf.mxu0  ;;  %v3851_v57 = vld [vmem:[#allocation8 + $0x2c8] ss:$16 sps:$4 sm:$0xff]   ;;  %v3910_v44 = vld [vmem:[#allocation10 + $0x40] sm:$0xff]  }
 0x1cb   :  { %v1606_v36 = vpop.f32.mrf.mxu1  ;;  %3349 = vmatpush3.bf16.msra.mxu0 %v3897_v62  ;;  %v3908_v42 = vld [vmem:[#allocation10 + $0x48] sm:$0xff]   ;;  %v3911_v45 = vld [vmem:[#allocation10] sm:$0xff]  }
 0x1cc   :  { %v1646_v50 = vadd.f32 %v1645_v46, %v1605_v48  ;;  %v1652_v52 = vmax.f32 %v1644_v47, 0.0  ;;  %v1648_v54 = vpop.f32.mrf.mxu0  ;;  %3350 = vmatprep.subr.bf16.mxu0 %v3898_v63  ;;  %v3909_v43 = vld [vmem:[#allocation10 + $0x8] sm:$0xff]   ;;  %v3912_v46 = vld [vmem:[#allocation10 + $0xf8] sm:$0xff]   ;;  %v3914_v48 = vld [vmem:[#allocation10 + $0xf0] sm:$0xff]  }
 0x1cd   :  { %v1607_v53 = vpop.f32.mrf.mxu1  ;;  %v3913_v47 = vld [vmem:[#allocation10 + $0xb8] sm:$0xff]   ;;  %v3915_v36 = vld [vmem:[#allocation10 + $0xb0] sm:$0xff]   ;;  %v3916_v49 = vld [vmem:[#allocation10 + $0xe8] sm:$0xff]  }
 0x1ce   :  { %v1653_v55 = vmax.f32 %v1646_v50, 0.0  ;;  %v4187_v59 = vpack.c.bf16 %v1652_v52, %v1652_v52  ;;  %v3917_v50 = vld [vmem:[#allocation10 + $0xa8] sm:$0xff]   ;;  %v3918_v52 = vld [vmem:[#allocation10 + $0xe0] sm:$0xff]   ;;  %v3920_v54 = vld [vmem:[#allocation10 + $0xd8] sm:$0xff]  }
 0x1cf   :  { %3351 = vmatpush3.bf16.msra.mxu0 %v3899_v1  ;;  %v3919_v53 = vld [vmem:[#allocation10 + $0xa0] sm:$0xff]   ;;  %v3924_v63 = vld [vmem:[#allocation10 + $0xc8] sm:$0xff]  }
 0x1d0   :  { %v1657_v56 = vpack.c.bf16 %v1653_v55, %v1653_v55  ;;  %3352 = vmatprep.subr.bf16.mxu0 %v3900_v2  ;;  %v3921_v55 = vld [vmem:[#allocation10 + $0x98] sm:$0xff]   ;;  %v3927_v1 = vld [vmem:[#allocation10 + $0x80] sm:$0xff]  }
 0x1d1   :  { %v1786_v2 = vld [vmem:[%s4212_s4] sm:$0xf] }
 0x1d2   :  { %2521 = vmatprep.mubr.bf16.mxu1 %v1657_v56 }
 0x1d3   :  { %2522 = vmatmul.mubr.bf16.vlgmr.msra.gmra.mxu1 %v4187_v59  ;;  %3353 = vmatpush3.bf16.msra.mxu0 %v3901_v5  ;;  %v1791_v5 = vrot.slane %v1786_v2, %v296_v6  ;;  %v1799_v6 = vrot.slane %v1786_v2, %v304_v26 }
 0x1d4   :  { %2572 = vmatpush1.bf16.msra.mxu1 %v3848_v58  ;;  %2603 = vmatprep.mubr.bf16.mxu1 %v1657_v56  ;;  %v3922_v56 = vld [vmem:[#allocation10 + $0xd0] sm:$0xff]  }
 0x1d5   :  { %2573 = vmatprep.subr.bf16.mxu1 %v3853_v60  ;;  %3354 = vmatprep.subr.bf16.mxu0 %v3902_v8  ;;  %v3923_v58 = vld [vmem:[#allocation10 + $0x90] sm:$0xff]  }
 0x1d7   :  { %3355 = vmatpush3.bf16.msra.mxu0 %v3903_v11 }
 0x1d8   :  { %2574 = vmatpush1.bf16.msra.mxu1 %v3851_v57  ;;  %3356 = vmatprep.subr.bf16.mxu0 %v3904_v39  ;;  %v3925_v57 = vld [vmem:[#allocation10 + $0x88] sm:$0xff]  }
 0x1d9   :  { %2575 = vmatprep.subr.bf16.mxu1 %v3856_v0  ;;  %v3926_v0 = vld [vmem:[#allocation10 + $0xc0] sm:$0xff]  }
 0x1db   :  { %3357 = vmatpush3.bf16.msra.mxu0 %v3905_v33 }
 0x1dc   :  { %2576 = vmatpush1.bf16.msra.mxu1 %v3854_v3  ;;  %3358 = vmatprep.subr.bf16.mxu0 %v3906_v40 }
 0x1dd   :  { %2577 = vmatprep.subr.bf16.mxu1 %v3859_v4 }
 0x1df   :  { %3359 = vmatpush3.bf16.msra.mxu0 %v3907_v41 }
 0x1e0   :  { %2578 = vmatpush1.bf16.msra.mxu1 %v3857_v9  ;;  %3360 = vmatprep.subr.bf16.mxu0 %v3908_v42  ;;  %v1795_v9 = vrot.slane %v1786_v2, %v300_v37  ;;  %v1803_v37 = vrot.slane %v1786_v2, %v308_v28  ;;  %v3315_v28 = vld [vmem:[%s4214_s6] ss:$0 sm:$0xff] }
 0x1e1   :  { %2579 = vmatprep.subr.bf16.mxu1 %v3862_v10 }
 0x1e3   :  { %3361 = vmatpush3.bf16.msra.mxu0 %v3909_v43 }
 0x1e4   :  { %2580 = vmatpush1.bf16.msra.mxu1 %v3860_v12  ;;  %3362 = vmatprep.subr.bf16.mxu0 %v3910_v44 }
 0x1e5   :  { %2581 = vmatprep.subr.bf16.mxu1 %v3865_v15 }
 0x1e7   :  { %3363 = vmatpush3.bf16.msra.mxu0 %v3911_v45 }
 0x1e8   :  { %2582 = vmatpush1.bf16.msra.mxu1 %v3863_v16 }
 0x1e9   :  { %2583 = vmatprep.subr.bf16.mxu1 %v3868_v17 }
 0x1ec   :  { %2584 = vmatpush1.bf16.msra.mxu1 %v3866_v18 }
 0x1ed   :  { %2585 = vmatprep.subr.bf16.mxu1 %v3871_v19 }
 0x1f0   :  { %2586 = vmatpush1.bf16.msra.mxu1 %v3869_v20 }
 0x1f1   :  { %2587 = vmatprep.subr.bf16.mxu1 %v3874_v21 }
 0x1f4   :  { %2588 = vmatpush2.bf16.msra.mxu1 %v3872_v22 }
 0x1f5   :  { %2589 = vmatprep.subr.bf16.mxu1 %v3877_v23 }
 0x1f8   :  { %2590 = vmatpush2.bf16.msra.mxu1 %v3875_v24 }
 0x1f9   :  { %2591 = vmatprep.subr.bf16.mxu1 %v3880_v25 }
 0x1fc   :  { %2592 = vmatpush2.bf16.msra.mxu1 %v3878_v27 }
 0x1fd   :  { %2593 = vmatprep.subr.bf16.mxu1 %v3883_v7 }
 0x200   :  { %2594 = vmatpush2.bf16.msra.mxu1 %v3881_v29 }
 0x201   :  { %2595 = vmatprep.subr.bf16.mxu1 %v3886_v13 }
 0x204   :  { %2596 = vmatpush2.bf16.msra.mxu1 %v3884_v30 }
 0x205   :  { %2597 = vmatprep.subr.bf16.mxu1 %v3889_v31 }
 0x208   :  { %2598 = vmatpush2.bf16.msra.mxu1 %v3887_v14 }
 0x209   :  { %2599 = vmatprep.subr.bf16.mxu1 %v3892_v32 }
 0x20c   :  { %2600 = vmatpush2.bf16.msra.mxu1 %v3890_v51 }
 0x20d   :  { %2601 = vmatprep.subr.bf16.mxu1 %v3895_v34 }
 0x210   :  { %2602 = vmatpush2.bf16.msra.mxu1 %v3893_v38 }
 0x211   :  { %3370 = vmatprep.subr.bf16.mxu1 %v3912_v46 }
 0x213   :  { %2604 = vmatmul.mubr.bf16.vlgmr.msra.gmra.mxu1 %v4187_v59 }
 0x214   :  { %3371 = vmatpush3.bf16.msra.mxu1 %v3913_v47 }
 0x215   :  { %3372 = vmatprep.subr.bf16.mxu1 %v3914_v48 }
 0x218   :  { %3373 = vmatpush3.bf16.msra.mxu1 %v3915_v36 }
 0x219   :  { %3374 = vmatprep.subr.bf16.mxu1 %v3916_v49 }
 0x21c   :  { %3375 = vmatpush3.bf16.msra.mxu1 %v3917_v50 }
 0x21d   :  { %3376 = vmatprep.subr.bf16.mxu1 %v3918_v52 }
 0x220   :  { %3377 = vmatpush3.bf16.msra.mxu1 %v3919_v53 }
 0x221   :  { %3378 = vmatprep.subr.bf16.mxu1 %v3920_v54 }
 0x224   :  { %3379 = vmatpush3.bf16.msra.mxu1 %v3921_v55 }
 0x225   :  { %3380 = vmatprep.subr.bf16.mxu1 %v3922_v56 }
 0x228   :  { %3381 = vmatpush3.bf16.msra.mxu1 %v3923_v58 }
 0x229   :  { %3382 = vmatprep.subr.bf16.mxu1 %v3924_v63 }
 0x22c   :  { %3383 = vmatpush3.bf16.msra.mxu1 %v3925_v57 }
 0x22d   :  { %3384 = vmatprep.subr.bf16.mxu1 %v3926_v0 }
 0x230   :  { %3385 = vmatpush3.bf16.msra.mxu1 %v3927_v1 }
 0x24a   :  { %v2482_v59 = vpop.f32.mrf.mxu0 }
 0x24b   :  { %v2483_v11 = vadd.f32 %v2482_v59, %v1791_v5 }
 0x24c   :  { %v2484_v60 = vpop.f32.mrf.mxu0 }
 0x24d   :  { %v2485_v15 = vadd.f32 %v2484_v60, %v1795_v9 }
 0x24e   :  { %v2486_v61 = vpop.f32.mrf.mxu0 }
 0x250   :  { %v2487_v62 = vpop.f32.mrf.mxu0 }
 0x28a   :  { %v2564_v3 = vpop.f32.mrf.mxu0 }
 0x28b   :  { %v2565_v25 = vadd.f32 %v2564_v3, %v1799_v6 }
 0x28c   :  { %v2566_v4 = vpop.f32.mrf.mxu0 }
 0x28d   :  { %v2567_v7 = vadd.f32 %v2566_v4, %v1803_v37 }
 0x28e   :  { %v2568_v8 = vpop.f32.mrf.mxu0 }
 0x290   :  { %v2569_v10 = vpop.f32.mrf.mxu0 }
 0x293   :  { %v2523_v12 = vpop.f32.mrf.mxu1 }
 0x294   :  { %v2524_v16 = vadd.f32 %v2523_v12, %v2483_v11 }
 0x295   :  { %v2525_v17 = vpop.f32.mrf.mxu1 }
 0x296   :  { %v2526_v18 = vadd.f32 %v2525_v17, %v2485_v15  ;;  %v2612_v19 = vmax.f32 %v2524_v16, 0.0 }
 0x297   :  { %v2527_v20 = vpop.f32.mrf.mxu1 }
 0x298   :  { %v2613_v21 = vmax.f32 %v2526_v18, 0.0  ;;  %v2616_v24 = vpack.c.bf16 %v2612_v19, %v2612_v19 }
 0x299   :  { %v2528_v22 = vpop.f32.mrf.mxu1 }
 0x29a   :  { %v2617_v23 = vpack.c.bf16 %v2613_v21, %v2613_v21 }
 0x29c   :  { %2915 = vmatprep.mubr.bf16.mxu0 %v2617_v23 }
 0x29d   :  { %2916 = vmatmul.mubr.bf16.vlgmr.msra.gmra.mxu0 %v2616_v24 }
 0x2d3   :  { %v2605_v27 = vpop.f32.mrf.mxu1 }
 0x2d4   :  { %v2606_v29 = vadd.f32 %v2605_v27, %v2565_v25 }
 0x2d5   :  { %v2607_v13 = vpop.f32.mrf.mxu1 }
 0x2d6   :  { %v2608_v30 = vadd.f32 %v2607_v13, %v2567_v7  ;;  %v2614_v31 = vmax.f32 %v2606_v29, 0.0 }
 0x2d7   :  { %v2609_v14 = vpop.f32.mrf.mxu1 }
 0x2d8   :  { %v2615_v32 = vmax.f32 %v2608_v30, 0.0  ;;  %v2618_v38 = vpack.c.bf16 %v2614_v31, %v2614_v31 }
 0x2d9   :  { %v2610_v51 = vpop.f32.mrf.mxu1 }
 0x2da   :  { %v2619_v34 = vpack.c.bf16 %v2615_v32, %v2615_v32 }
 0x2dc   :  { %2955 = vmatprep.mubr.bf16.mxu1 %v2619_v34 }
 0x2dd   :  { %2956 = vmatmul.mubr.bf16.vlgmr.msra.gmra.mxu1 %v2618_v38 }
 0x35d   :  { %v3364_v39 = vpop.f32.mrf.mxu0 }
 0x35f   :  { %v3365_v33 = vpop.f32.mrf.mxu0 }
 0x360   :  { %v3366_v35 = vadd.f32 %v3365_v33, %v3364_v39 }
 0x361   :  { %v3367_v26 = vpop.f32.mrf.mxu0 }
 0x362   :  { %v2918_v43 = vadd.f32 %v3366_v35, %v3315_v28 }
 0x363   :  { %v3368_v40 = vpop.f32.mrf.mxu0 }
 0x39d   :  { %v3386_v41 = vpop.f32.mrf.mxu1 }
 0x39f   :  { %v3387_v42 = vpop.f32.mrf.mxu1 }
 0x3a0   :  { %v3388_v44 = vadd.f32 %v3387_v42, %v3386_v41 }
 0x3a1   :  { %v3389_v45 = vpop.f32.mrf.mxu1 }
 0x3a2   :  { %v2958_v46 = vadd.f32 %v3388_v44, %v2918_v43 }
 0x3a3   :  { %v3390_v47 = vpop.f32.mrf.mxu1 }
 0x3a4   :  { %v2963_v48 = vpack.c.bf16 %v2958_v46, %v2958_v46 }
 0x3a6   :  { %2964 = vst [vmem:[#allocation11] sm:$0xf] %v2963_v48 }
 0x3a7   :  { %4040 = shalt.err (!%p4037_p1)
}
 0x3a8   :  { %2974 = dma.vmem_to_hbm [thread:$0]  %s2972_s29, 64, %s4215_s7, [#allocation4]  }
 0x3a9   :  { %4055 = dma.done.wait [#allocation4], 64  }
 0x3aa   :  { %4056 = vsyncadd [#allocation4], 4294967232 }
 0x3ab   :  { %2978 = vsyncpa [#allocation3], 1 }
 0x3ac   :  { %2979 = vsyncpa [#allocation6], 1 }
 0x3ad   :  { %2980 = vsyncpa [#allocation9], 1 }
 0x3ae   :  { %2981 = vsyncpa [#allocation4], 1 }

</bundles_post_ra>
